<compile_context>
chip_gen: v6e
topology: v6e:2x2x1
jax: 0.10.0
libtpu: 0.0.40
codegen_flags: <defaults>
</compile_context>

<pallas_src>
import functools

import jax
import jax.numpy as jnp
from jax.experimental import pallas as pl
from jax.experimental.pallas import tpu as pltpu


def _round_up(n, m):
    return ((n + m - 1) // m) * m


# ------------------------------ fused kernel ---------------------------------

def _fused_lstm_kernel(*refs, num_layers, seq_len, batch_pad):
    """Inputs : x2d (T*Bp, I),
                W_ih0^T (I,4H), W_hh0^T (H,4H), b0 (1,4H),
                [W_cat_l (2H,4H), b_l (1,4H)]   for l = 1..L-1,
                W_fc^T (H,C), b_fc (1,C)
       Output : out (L*Bp, C)  (pad rows dropped by the wrapper)."""
    L = num_layers
    T = seq_len
    Bp = batch_pad

    x_ref = refs[0]
    w_ih0_ref, w_hh0_ref, b0_ref = refs[1], refs[2], refs[3]
    deep_refs = refs[4:4 + 2 * (L - 1)]
    w_fc_ref = refs[4 + 2 * (L - 1)]
    b_fc_ref = refs[5 + 2 * (L - 1)]
    out_ref = refs[6 + 2 * (L - 1)]

    I = x_ref.shape[1]
    H = w_hh0_ref.shape[0]

    # ---- Hoisted layer-0 input projection (one matmul), bias folded in. ----
    gx0 = jnp.dot(x_ref[...], w_ih0_ref[...],
                  preferred_element_type=jnp.float32) + b0_ref[...]   # (T*Bp, 4H)

    # Hoisted weight loads (values; compiler manages residency).
    # TODO(synk): for larger H, keep W_hh resident in MXU staging registers via
    # pltpu.matmul_push_rhs/matmul_acc_lhs and cast MXU operands to bf16
    # (v6e/v7x); unnecessary at H=32 and it would loosen the f32 check.
    w_hh0 = w_hh0_ref[...]
    w_cat = [None] + [deep_refs[2 * (l - 1)][...] for l in range(1, L)]
    b_deep = [None] + [deep_refs[2 * (l - 1) + 1][...] for l in range(1, L)]

    # Register-carried recurrent state (no VMEM scratch on the serial chain).
    h = [jnp.zeros((Bp, H), jnp.float32) for _ in range(L)]
    c = [jnp.zeros((Bp, H), jnp.float32) for _ in range(L)]

    def gate_step(gates, c_prev):
        # Gate order [i, f, o, g]: one sigmoid over the first 3H columns,
        # one tanh for g, one tanh for the new cell -> 3 EUP pushes per step.
        sig = jax.nn.sigmoid(gates[:, 0:3 * H])
        i_g = sig[:, 0:H]
        f_g = sig[:, H:2 * H]
        o_g = sig[:, 2 * H:3 * H]
        g_g = jnp.tanh(gates[:, 3 * H:4 * H])
        c_new = f_g * c_prev + i_g * g_g
        h_new = o_g * jnp.tanh(c_new)
        return h_new, c_new

    # ---- Wavefront recurrence: step s processes (layer l, time t = s - l). ----
    # T + L - 1 serial steps instead of L * T; all per-step layer updates are
    # independent (computed from the snapshot) so their MXU/EUP ops pipeline.
    # TODO(synk): for large T, switch to lax.fori_loop(unroll=True) with a
    # (h, c) carry tuple to bound live ranges; at T=8 full unroll is cheaper.
    for s in range(T + L - 1):
        h_prev = list(h)
        c_prev = list(c)
        for l in range(L):
            t = s - l
            if 0 <= t < T:
                if l == 0:
                    gates = gx0[t * Bp:(t + 1) * Bp, :] + jnp.dot(
                        h_prev[0], w_hh0, preferred_element_type=jnp.float32)
                else:
                    # Fused input+recurrent projection: [h_{l-1}[t], h_l[t-1]]
                    # @ [W_ih^T; W_hh^T]  -> one (Bp, 2H) @ (2H, 4H) matmul.
                    inp = jnp.concatenate([h_prev[l - 1], h_prev[l]], axis=-1)
                    gates = jnp.dot(inp, w_cat[l],
                                    preferred_element_type=jnp.float32) + b_deep[l]
                h[l], c[l] = gate_step(gates, c_prev[l])

    # ---- Fused FC + sigmoid on the tile-aligned padded final hidden states. ----
    h_fin = jnp.concatenate(h, axis=0)                         # (L*Bp, H)
    logits = jnp.dot(h_fin, w_fc_ref[...],
                     preferred_element_type=jnp.float32) + b_fc_ref[...]
    out_ref[...] = jax.nn.sigmoid(logits)


# ------------------------------ model forward --------------------------------

def _reorder_gates(w, H):
    """Permute the 4H axis from PyTorch [i, f, g, o] to [i, f, o, g]."""
    del H
    i, f, g, o = jnp.split(w, 4, axis=-1)
    return jnp.concatenate([i, f, o, g], axis=-1)


def lstm_model_forward(x_bti, params):
    """Equivalent of LSTM.forward(x, device) with zero-initialized (h_0, c_0).

    x_bti: (B, T, input_size), batch_first like the torch module.
    Returns: (num_layers * B, num_classes) after sigmoid(fc(h_out)).
    """
    B, T, I = x_bti.shape
    L = len(params["layers"])
    H = params["layers"][0]["w_hh_t"].shape[0]
    C = params["w_fc_t"].shape[1]

    # Sublane-pad the batch so all in-kernel tiles are dense (full sublanes).
    Bp = max(8, _round_up(B, 8))

    # Time-major + batch pad + flatten to (T*Bp, I): tiny one-time XLA ops.
    x_tbi = jnp.transpose(x_bti, (1, 0, 2))
    if Bp != B:
        x_tbi = jnp.pad(x_tbi, ((0, 0), (0, Bp - B), (0, 0)))
    x_2d = x_tbi.reshape(T * Bp, I)

    # Param prep (one-time, zero per-step cost): gate reorder + deep-layer
    # [W_ih^T; W_hh^T] stacking.
    l0 = params["layers"][0]
    inputs = [x_2d,
              _reorder_gates(l0["w_ih_t"], H),
              _reorder_gates(l0["w_hh_t"], H),
              _reorder_gates(l0["bias"], H)]
    for lp in params["layers"][1:]:
        w_cat = jnp.concatenate(
            [_reorder_gates(lp["w_ih_t"], H), _reorder_gates(lp["w_hh_t"], H)],
            axis=0)                                            # (2H, 4H)
        inputs += [w_cat, _reorder_gates(lp["bias"], H)]
    inputs += [params["w_fc_t"], params["b_fc"]]

    kernel = functools.partial(_fused_lstm_kernel, num_layers=L, seq_len=T,
                               batch_pad=Bp)

    # TODO(synk): at much larger H/T, cast weights to bf16 (v6e/v7x), tile the
    # hoisted projection over T, and set vmem_limit_bytes for v7x's 64 MiB
    # VMEM; at these sizes everything fits comfortably. For batch >= 16 on
    # v7x, add a "parallel" batch grid axis to use both TensorCores.
    out_pad = pl.pallas_call(
        kernel,
        out_shape=jax.ShapeDtypeStruct((L * Bp, C), jnp.float32),
        in_specs=[pl.BlockSpec(memory_space=pltpu.MemorySpace.VMEM)
                  for _ in inputs],
        out_specs=pl.BlockSpec(memory_space=pltpu.MemorySpace.VMEM),
    )(*inputs)

    # Drop the sublane pad rows: valid rows of each layer are [0, B).
    return out_pad.reshape(L, Bp, C)[:, :B, :].reshape(L * B, C)


# ------------------------------ pure-JAX reference ----------------------------

def _reference_forward(x_bti, params):
    x_tbi = jnp.transpose(x_bti, (1, 0, 2))
    layer_in = x_tbi
    h_finals = []
    for lp in params["layers"]:
        H = lp["w_hh_t"].shape[0]
        B = x_tbi.shape[1]
        h = jnp.zeros((B, H), jnp.float32)
        c = jnp.zeros((B, H), jnp.float32)
        outs = []
        for t in range(layer_in.shape[0]):
            gates = layer_in[t] @ lp["w_ih_t"] + h @ lp["w_hh_t"] + lp["bias"]
            i = jax.nn.sigmoid(gates[:, 0 * H:1 * H])
            f = jax.nn.sigmoid(gates[:, 1 * H:2 * H])
            g = jnp.tanh(gates[:, 2 * H:3 * H])
            o = jax.nn.sigmoid(gates[:, 3 * H:4 * H])
            c = f * c + i * g
            h = o * jnp.tanh(c)
            outs.append(h)
        h_finals.append(h)
        layer_in = jnp.stack(outs, axis=0)
    h_out = jnp.concatenate(h_finals, axis=0)
    return jax.nn.sigmoid(h_out @ params["w_fc_t"] + params["b_fc"])


# ----------------------------------- main --------------------------------------

def _init_params(key, num_classes, input_size, hidden_size, num_layers):
    """Deterministic uniform(-1/sqrt(H), 1/sqrt(H)) init, like torch's default."""
    k = 1.0 / jnp.sqrt(hidden_size)
    params = {"layers": []}
    for layer in range(num_layers):
        in_dim = input_size if layer == 0 else hidden_size
        key, k1, k2, k3, k4 = jax.random.split(key, 5)
        w_ih = jax.random.uniform(k1, (4 * hidden_size, in_dim), jnp.float32, -k, k)
        w_hh = jax.random.uniform(k2, (4 * hidden_size, hidden_size), jnp.float32, -k, k)
        b_ih = jax.random.uniform(k3, (4 * hidden_size,), jnp.float32, -k, k)
        b_hh = jax.random.uniform(k4, (4 * hidden_size,), jnp.float32, -k, k)
        params["layers"].append({
            "w_ih_t": w_ih.T,                         # (in_dim, 4H), [i|f|g|o]
            "w_hh_t": w_hh.T,                         # (H, 4H),     [i|f|g|o]
            "bias": (b_ih + b_hh)[None, :],           # (1, 4H)
        })
    key, k5, k6 = jax.random.split(key, 3)
    w_fc = jax.random.uniform(k5, (num_classes, hidden_size), jnp.float32, -k, k)
    b_fc = jax.random.uniform(k6, (num_classes,), jnp.float32, -k, k)
    params["w_fc_t"] = w_fc.T                          # (H, C)
    params["b_fc"] = b_fc[None, :]                     # (1, C)
    return params


if __name__ == "__main__":
    num_classes = 4
    input_size = 16
    hidden_size = 32
    num_layers = 2
    batch = 2
    seq_len = 8

    key = jax.random.PRNGKey(0)
    key, kx = jax.random.split(key)
    x = jax.random.normal(kx, (batch, seq_len, input_size), jnp.float32)

    params = _init_params(key, num_classes, input_size, hidden_size, num_layers)

    out = lstm_model_forward(x, params)
    out = jax.block_until_ready(out)

    ref = _reference_forward(x, params)
    assert out.shape == (num_layers * batch, num_classes), out.shape
    assert jnp.allclose(out, ref, atol=1e-5, rtol=1e-5), "mismatch vs reference"

    print("KERNEL_OK")
</pallas_src>

<mosaic_0001>
module attributes {stable_mosaic.version = 11 : i64} {
  func.func @_fused_lstm_kernel(%arg0: memref<64x16xf32, #tpu.memory_space<vmem>>, %arg1: memref<16x128xf32, #tpu.memory_space<vmem>>, %arg2: memref<32x128xf32, #tpu.memory_space<vmem>>, %arg3: memref<1x128xf32, #tpu.memory_space<vmem>>, %arg4: memref<64x128xf32, #tpu.memory_space<vmem>>, %arg5: memref<1x128xf32, #tpu.memory_space<vmem>>, %arg6: memref<32x4xf32, #tpu.memory_space<vmem>>, %arg7: memref<1x4xf32, #tpu.memory_space<vmem>>, %arg8: memref<16x4xf32, #tpu.memory_space<vmem>>) attributes {dimension_semantics = [], scalar_prefetch = 0 : i64, scratch_operands = 0 : i64, tpu.core_type = #tpu.core_type<tc>} {
    %c0 = arith.constant 0 : index
    %c0_0 = arith.constant 0 : index
    %0 = vector.load %arg0[%c0, %c0_0] : memref<64x16xf32, #tpu.memory_space<vmem>>, vector<64x16xf32>
    %c0_1 = arith.constant 0 : index
    %c0_2 = arith.constant 0 : index
    %1 = vector.load %arg1[%c0_1, %c0_2] : memref<16x128xf32, #tpu.memory_space<vmem>>, vector<16x128xf32>
    %cst = arith.constant dense<0.000000e+00> : vector<64x128xf32>
    %2 = tpu.matmul %0, %1, %cst {dimension_numbers = #tpu.dot_dimension_numbers<[1], [0], [0], [1], [0, 0, 1, 1], [], []>} : vector<64x16xf32>, vector<16x128xf32>, vector<64x128xf32> -> vector<64x128xf32>
    %c0_3 = arith.constant 0 : index
    %c0_4 = arith.constant 0 : index
    %3 = vector.load %arg3[%c0_3, %c0_4] : memref<1x128xf32, #tpu.memory_space<vmem>>, vector<1x128xf32>
    %4 = vector.broadcast %3 : vector<1x128xf32> to vector<64x128xf32>
    %5 = arith.addf %2, %4 : vector<64x128xf32>
    %c0_5 = arith.constant 0 : index
    %c0_6 = arith.constant 0 : index
    %6 = vector.load %arg2[%c0_5, %c0_6] : memref<32x128xf32, #tpu.memory_space<vmem>>, vector<32x128xf32>
    %c0_7 = arith.constant 0 : index
    %c0_8 = arith.constant 0 : index
    %7 = vector.load %arg4[%c0_7, %c0_8] : memref<64x128xf32, #tpu.memory_space<vmem>>, vector<64x128xf32>
    %c0_9 = arith.constant 0 : index
    %c0_10 = arith.constant 0 : index
    %8 = vector.load %arg5[%c0_9, %c0_10] : memref<1x128xf32, #tpu.memory_space<vmem>>, vector<1x128xf32>
    %cst_11 = arith.constant 0.000000e+00 : f32
    %9 = vector.broadcast %cst_11 : f32 to vector<8x32xf32>
    %cst_12 = arith.constant 0.000000e+00 : f32
    %10 = vector.broadcast %cst_12 : f32 to vector<8x32xf32>
    %cst_13 = arith.constant 0.000000e+00 : f32
    %11 = vector.broadcast %cst_13 : f32 to vector<8x32xf32>
    %cst_14 = arith.constant 0.000000e+00 : f32
    %12 = vector.broadcast %cst_14 : f32 to vector<8x32xf32>
    %13 = vector.extract_strided_slice %5 {offsets = [0, 0], sizes = [8, 128], strides = [1, 1]} : vector<64x128xf32> to vector<8x128xf32>
    %cst_15 = arith.constant dense<0.000000e+00> : vector<8x128xf32>
    %14 = tpu.matmul %9, %6, %cst_15 {dimension_numbers = #tpu.dot_dimension_numbers<[1], [0], [0], [1], [0, 0, 1, 1], [], []>} : vector<8x32xf32>, vector<32x128xf32>, vector<8x128xf32> -> vector<8x128xf32>
    %15 = arith.addf %13, %14 : vector<8x128xf32>
    %16 = vector.extract_strided_slice %15 {offsets = [0, 0], sizes = [8, 96], strides = [1, 1]} : vector<8x128xf32> to vector<8x96xf32>
    %17 = arith.negf %16 : vector<8x96xf32>
    %18 = math.exp %17 : vector<8x96xf32>
    %cst_16 = arith.constant 1.000000e+00 : f32
    %19 = vector.broadcast %cst_16 : f32 to vector<8x96xf32>
    %20 = arith.addf %19, %18 : vector<8x96xf32>
    %21 = arith.divf %19, %20 : vector<8x96xf32>
    %22 = vector.extract_strided_slice %21 {offsets = [0, 0], sizes = [8, 32], strides = [1, 1]} : vector<8x96xf32> to vector<8x32xf32>
    %23 = vector.extract_strided_slice %21 {offsets = [0, 32], sizes = [8, 32], strides = [1, 1]} : vector<8x96xf32> to vector<8x32xf32>
    %24 = vector.extract_strided_slice %21 {offsets = [0, 64], sizes = [8, 32], strides = [1, 1]} : vector<8x96xf32> to vector<8x32xf32>
    %25 = vector.extract_strided_slice %15 {offsets = [0, 96], sizes = [8, 32], strides = [1, 1]} : vector<8x128xf32> to vector<8x32xf32>
    %26 = math.tanh %25 : vector<8x32xf32>
    %27 = arith.mulf %23, %11 : vector<8x32xf32>
    %28 = arith.mulf %22, %26 : vector<8x32xf32>
    %29 = arith.addf %27, %28 : vector<8x32xf32>
    %30 = math.tanh %29 : vector<8x32xf32>
    %31 = arith.mulf %24, %30 : vector<8x32xf32>
    %32 = vector.extract_strided_slice %5 {offsets = [8, 0], sizes = [8, 128], strides = [1, 1]} : vector<64x128xf32> to vector<8x128xf32>
    %cst_17 = arith.constant dense<0.000000e+00> : vector<8x128xf32>
    %33 = tpu.matmul %31, %6, %cst_17 {dimension_numbers = #tpu.dot_dimension_numbers<[1], [0], [0], [1], [0, 0, 1, 1], [], []>} : vector<8x32xf32>, vector<32x128xf32>, vector<8x128xf32> -> vector<8x128xf32>
    %34 = arith.addf %32, %33 : vector<8x128xf32>
    %35 = vector.extract_strided_slice %34 {offsets = [0, 0], sizes = [8, 96], strides = [1, 1]} : vector<8x128xf32> to vector<8x96xf32>
    %36 = arith.negf %35 : vector<8x96xf32>
    %37 = math.exp %36 : vector<8x96xf32>
    %cst_18 = arith.constant 1.000000e+00 : f32
    %38 = vector.broadcast %cst_18 : f32 to vector<8x96xf32>
    %39 = arith.addf %38, %37 : vector<8x96xf32>
    %40 = arith.divf %38, %39 : vector<8x96xf32>
    %41 = vector.extract_strided_slice %40 {offsets = [0, 0], sizes = [8, 32], strides = [1, 1]} : vector<8x96xf32> to vector<8x32xf32>
    %42 = vector.extract_strided_slice %40 {offsets = [0, 32], sizes = [8, 32], strides = [1, 1]} : vector<8x96xf32> to vector<8x32xf32>
    %43 = vector.extract_strided_slice %40 {offsets = [0, 64], sizes = [8, 32], strides = [1, 1]} : vector<8x96xf32> to vector<8x32xf32>
    %44 = vector.extract_strided_slice %34 {offsets = [0, 96], sizes = [8, 32], strides = [1, 1]} : vector<8x128xf32> to vector<8x32xf32>
    %45 = math.tanh %44 : vector<8x32xf32>
    %46 = arith.mulf %42, %29 : vector<8x32xf32>
    %47 = arith.mulf %41, %45 : vector<8x32xf32>
    %48 = arith.addf %46, %47 : vector<8x32xf32>
    %49 = math.tanh %48 : vector<8x32xf32>
    %50 = arith.mulf %43, %49 : vector<8x32xf32>
    %51 = tpu.concatenate %31, %10 in 1 : vector<8x32xf32>, vector<8x32xf32> -> vector<8x64xf32>
    %cst_19 = arith.constant dense<0.000000e+00> : vector<8x128xf32>
    %52 = tpu.matmul %51, %7, %cst_19 {dimension_numbers = #tpu.dot_dimension_numbers<[1], [0], [0], [1], [0, 0, 1, 1], [], []>} : vector<8x64xf32>, vector<64x128xf32>, vector<8x128xf32> -> vector<8x128xf32>
    %53 = vector.broadcast %8 : vector<1x128xf32> to vector<8x128xf32>
    %54 = arith.addf %52, %53 : vector<8x128xf32>
    %55 = vector.extract_strided_slice %54 {offsets = [0, 0], sizes = [8, 96], strides = [1, 1]} : vector<8x128xf32> to vector<8x96xf32>
    %56 = arith.negf %55 : vector<8x96xf32>
    %57 = math.exp %56 : vector<8x96xf32>
    %cst_20 = arith.constant 1.000000e+00 : f32
    %58 = vector.broadcast %cst_20 : f32 to vector<8x96xf32>
    %59 = arith.addf %58, %57 : vector<8x96xf32>
    %60 = arith.divf %58, %59 : vector<8x96xf32>
    %61 = vector.extract_strided_slice %60 {offsets = [0, 0], sizes = [8, 32], strides = [1, 1]} : vector<8x96xf32> to vector<8x32xf32>
    %62 = vector.extract_strided_slice %60 {offsets = [0, 32], sizes = [8, 32], strides = [1, 1]} : vector<8x96xf32> to vector<8x32xf32>
    %63 = vector.extract_strided_slice %60 {offsets = [0, 64], sizes = [8, 32], strides = [1, 1]} : vector<8x96xf32> to vector<8x32xf32>
    %64 = vector.extract_strided_slice %54 {offsets = [0, 96], sizes = [8, 32], strides = [1, 1]} : vector<8x128xf32> to vector<8x32xf32>
    %65 = math.tanh %64 : vector<8x32xf32>
    %66 = arith.mulf %62, %12 : vector<8x32xf32>
    %67 = arith.mulf %61, %65 : vector<8x32xf32>
    %68 = arith.addf %66, %67 : vector<8x32xf32>
    %69 = math.tanh %68 : vector<8x32xf32>
    %70 = arith.mulf %63, %69 : vector<8x32xf32>
    %71 = vector.extract_strided_slice %5 {offsets = [16, 0], sizes = [8, 128], strides = [1, 1]} : vector<64x128xf32> to vector<8x128xf32>
    %cst_21 = arith.constant dense<0.000000e+00> : vector<8x128xf32>
    %72 = tpu.matmul %50, %6, %cst_21 {dimension_numbers = #tpu.dot_dimension_numbers<[1], [0], [0], [1], [0, 0, 1, 1], [], []>} : vector<8x32xf32>, vector<32x128xf32>, vector<8x128xf32> -> vector<8x128xf32>
    %73 = arith.addf %71, %72 : vector<8x128xf32>
    %74 = vector.extract_strided_slice %73 {offsets = [0, 0], sizes = [8, 96], strides = [1, 1]} : vector<8x128xf32> to vector<8x96xf32>
    %75 = arith.negf %74 : vector<8x96xf32>
    %76 = math.exp %75 : vector<8x96xf32>
    %cst_22 = arith.constant 1.000000e+00 : f32
    %77 = vector.broadcast %cst_22 : f32 to vector<8x96xf32>
    %78 = arith.addf %77, %76 : vector<8x96xf32>
    %79 = arith.divf %77, %78 : vector<8x96xf32>
    %80 = vector.extract_strided_slice %79 {offsets = [0, 0], sizes = [8, 32], strides = [1, 1]} : vector<8x96xf32> to vector<8x32xf32>
    %81 = vector.extract_strided_slice %79 {offsets = [0, 32], sizes = [8, 32], strides = [1, 1]} : vector<8x96xf32> to vector<8x32xf32>
    %82 = vector.extract_strided_slice %79 {offsets = [0, 64], sizes = [8, 32], strides = [1, 1]} : vector<8x96xf32> to vector<8x32xf32>
    %83 = vector.extract_strided_slice %73 {offsets = [0, 96], sizes = [8, 32], strides = [1, 1]} : vector<8x128xf32> to vector<8x32xf32>
    %84 = math.tanh %83 : vector<8x32xf32>
    %85 = arith.mulf %81, %48 : vector<8x32xf32>
    %86 = arith.mulf %80, %84 : vector<8x32xf32>
    %87 = arith.addf %85, %86 : vector<8x32xf32>
    %88 = math.tanh %87 : vector<8x32xf32>
    %89 = arith.mulf %82, %88 : vector<8x32xf32>
    %90 = tpu.concatenate %50, %70 in 1 : vector<8x32xf32>, vector<8x32xf32> -> vector<8x64xf32>
    %cst_23 = arith.constant dense<0.000000e+00> : vector<8x128xf32>
    %91 = tpu.matmul %90, %7, %cst_23 {dimension_numbers = #tpu.dot_dimension_numbers<[1], [0], [0], [1], [0, 0, 1, 1], [], []>} : vector<8x64xf32>, vector<64x128xf32>, vector<8x128xf32> -> vector<8x128xf32>
    %92 = vector.broadcast %8 : vector<1x128xf32> to vector<8x128xf32>
    %93 = arith.addf %91, %92 : vector<8x128xf32>
    %94 = vector.extract_strided_slice %93 {offsets = [0, 0], sizes = [8, 96], strides = [1, 1]} : vector<8x128xf32> to vector<8x96xf32>
    %95 = arith.negf %94 : vector<8x96xf32>
    %96 = math.exp %95 : vector<8x96xf32>
    %cst_24 = arith.constant 1.000000e+00 : f32
    %97 = vector.broadcast %cst_24 : f32 to vector<8x96xf32>
    %98 = arith.addf %97, %96 : vector<8x96xf32>
    %99 = arith.divf %97, %98 : vector<8x96xf32>
    %100 = vector.extract_strided_slice %99 {offsets = [0, 0], sizes = [8, 32], strides = [1, 1]} : vector<8x96xf32> to vector<8x32xf32>
    %101 = vector.extract_strided_slice %99 {offsets = [0, 32], sizes = [8, 32], strides = [1, 1]} : vector<8x96xf32> to vector<8x32xf32>
    %102 = vector.extract_strided_slice %99 {offsets = [0, 64], sizes = [8, 32], strides = [1, 1]} : vector<8x96xf32> to vector<8x32xf32>
    %103 = vector.extract_strided_slice %93 {offsets = [0, 96], sizes = [8, 32], strides = [1, 1]} : vector<8x128xf32> to vector<8x32xf32>
    %104 = math.tanh %103 : vector<8x32xf32>
    %105 = arith.mulf %101, %68 : vector<8x32xf32>
    %106 = arith.mulf %100, %104 : vector<8x32xf32>
    %107 = arith.addf %105, %106 : vector<8x32xf32>
    %108 = math.tanh %107 : vector<8x32xf32>
    %109 = arith.mulf %102, %108 : vector<8x32xf32>
    %110 = vector.extract_strided_slice %5 {offsets = [24, 0], sizes = [8, 128], strides = [1, 1]} : vector<64x128xf32> to vector<8x128xf32>
    %cst_25 = arith.constant dense<0.000000e+00> : vector<8x128xf32>
    %111 = tpu.matmul %89, %6, %cst_25 {dimension_numbers = #tpu.dot_dimension_numbers<[1], [0], [0], [1], [0, 0, 1, 1], [], []>} : vector<8x32xf32>, vector<32x128xf32>, vector<8x128xf32> -> vector<8x128xf32>
    %112 = arith.addf %110, %111 : vector<8x128xf32>
    %113 = vector.extract_strided_slice %112 {offsets = [0, 0], sizes = [8, 96], strides = [1, 1]} : vector<8x128xf32> to vector<8x96xf32>
    %114 = arith.negf %113 : vector<8x96xf32>
    %115 = math.exp %114 : vector<8x96xf32>
    %cst_26 = arith.constant 1.000000e+00 : f32
    %116 = vector.broadcast %cst_26 : f32 to vector<8x96xf32>
    %117 = arith.addf %116, %115 : vector<8x96xf32>
    %118 = arith.divf %116, %117 : vector<8x96xf32>
    %119 = vector.extract_strided_slice %118 {offsets = [0, 0], sizes = [8, 32], strides = [1, 1]} : vector<8x96xf32> to vector<8x32xf32>
    %120 = vector.extract_strided_slice %118 {offsets = [0, 32], sizes = [8, 32], strides = [1, 1]} : vector<8x96xf32> to vector<8x32xf32>
    %121 = vector.extract_strided_slice %118 {offsets = [0, 64], sizes = [8, 32], strides = [1, 1]} : vector<8x96xf32> to vector<8x32xf32>
    %122 = vector.extract_strided_slice %112 {offsets = [0, 96], sizes = [8, 32], strides = [1, 1]} : vector<8x128xf32> to vector<8x32xf32>
    %123 = math.tanh %122 : vector<8x32xf32>
    %124 = arith.mulf %120, %87 : vector<8x32xf32>
    %125 = arith.mulf %119, %123 : vector<8x32xf32>
    %126 = arith.addf %124, %125 : vector<8x32xf32>
    %127 = math.tanh %126 : vector<8x32xf32>
    %128 = arith.mulf %121, %127 : vector<8x32xf32>
    %129 = tpu.concatenate %89, %109 in 1 : vector<8x32xf32>, vector<8x32xf32> -> vector<8x64xf32>
    %cst_27 = arith.constant dense<0.000000e+00> : vector<8x128xf32>
    %130 = tpu.matmul %129, %7, %cst_27 {dimension_numbers = #tpu.dot_dimension_numbers<[1], [0], [0], [1], [0, 0, 1, 1], [], []>} : vector<8x64xf32>, vector<64x128xf32>, vector<8x128xf32> -> vector<8x128xf32>
    %131 = vector.broadcast %8 : vector<1x128xf32> to vector<8x128xf32>
    %132 = arith.addf %130, %131 : vector<8x128xf32>
    %133 = vector.extract_strided_slice %132 {offsets = [0, 0], sizes = [8, 96], strides = [1, 1]} : vector<8x128xf32> to vector<8x96xf32>
    %134 = arith.negf %133 : vector<8x96xf32>
    %135 = math.exp %134 : vector<8x96xf32>
    %cst_28 = arith.constant 1.000000e+00 : f32
    %136 = vector.broadcast %cst_28 : f32 to vector<8x96xf32>
    %137 = arith.addf %136, %135 : vector<8x96xf32>
    %138 = arith.divf %136, %137 : vector<8x96xf32>
    %139 = vector.extract_strided_slice %138 {offsets = [0, 0], sizes = [8, 32], strides = [1, 1]} : vector<8x96xf32> to vector<8x32xf32>
    %140 = vector.extract_strided_slice %138 {offsets = [0, 32], sizes = [8, 32], strides = [1, 1]} : vector<8x96xf32> to vector<8x32xf32>
    %141 = vector.extract_strided_slice %138 {offsets = [0, 64], sizes = [8, 32], strides = [1, 1]} : vector<8x96xf32> to vector<8x32xf32>
    %142 = vector.extract_strided_slice %132 {offsets = [0, 96], sizes = [8, 32], strides = [1, 1]} : vector<8x128xf32> to vector<8x32xf32>
    %143 = math.tanh %142 : vector<8x32xf32>
    %144 = arith.mulf %140, %107 : vector<8x32xf32>
    %145 = arith.mulf %139, %143 : vector<8x32xf32>
    %146 = arith.addf %144, %145 : vector<8x32xf32>
    %147 = math.tanh %146 : vector<8x32xf32>
    %148 = arith.mulf %141, %147 : vector<8x32xf32>
    %149 = vector.extract_strided_slice %5 {offsets = [32, 0], sizes = [8, 128], strides = [1, 1]} : vector<64x128xf32> to vector<8x128xf32>
    %cst_29 = arith.constant dense<0.000000e+00> : vector<8x128xf32>
    %150 = tpu.matmul %128, %6, %cst_29 {dimension_numbers = #tpu.dot_dimension_numbers<[1], [0], [0], [1], [0, 0, 1, 1], [], []>} : vector<8x32xf32>, vector<32x128xf32>, vector<8x128xf32> -> vector<8x128xf32>
    %151 = arith.addf %149, %150 : vector<8x128xf32>
    %152 = vector.extract_strided_slice %151 {offsets = [0, 0], sizes = [8, 96], strides = [1, 1]} : vector<8x128xf32> to vector<8x96xf32>
    %153 = arith.negf %152 : vector<8x96xf32>
    %154 = math.exp %153 : vector<8x96xf32>
    %cst_30 = arith.constant 1.000000e+00 : f32
    %155 = vector.broadcast %cst_30 : f32 to vector<8x96xf32>
    %156 = arith.addf %155, %154 : vector<8x96xf32>
    %157 = arith.divf %155, %156 : vector<8x96xf32>
    %158 = vector.extract_strided_slice %157 {offsets = [0, 0], sizes = [8, 32], strides = [1, 1]} : vector<8x96xf32> to vector<8x32xf32>
    %159 = vector.extract_strided_slice %157 {offsets = [0, 32], sizes = [8, 32], strides = [1, 1]} : vector<8x96xf32> to vector<8x32xf32>
    %160 = vector.extract_strided_slice %157 {offsets = [0, 64], sizes = [8, 32], strides = [1, 1]} : vector<8x96xf32> to vector<8x32xf32>
    %161 = vector.extract_strided_slice %151 {offsets = [0, 96], sizes = [8, 32], strides = [1, 1]} : vector<8x128xf32> to vector<8x32xf32>
    %162 = math.tanh %161 : vector<8x32xf32>
    %163 = arith.mulf %159, %126 : vector<8x32xf32>
    %164 = arith.mulf %158, %162 : vector<8x32xf32>
    %165 = arith.addf %163, %164 : vector<8x32xf32>
    %166 = math.tanh %165 : vector<8x32xf32>
    %167 = arith.mulf %160, %166 : vector<8x32xf32>
    %168 = tpu.concatenate %128, %148 in 1 : vector<8x32xf32>, vector<8x32xf32> -> vector<8x64xf32>
    %cst_31 = arith.constant dense<0.000000e+00> : vector<8x128xf32>
    %169 = tpu.matmul %168, %7, %cst_31 {dimension_numbers = #tpu.dot_dimension_numbers<[1], [0], [0], [1], [0, 0, 1, 1], [], []>} : vector<8x64xf32>, vector<64x128xf32>, vector<8x128xf32> -> vector<8x128xf32>
    %170 = vector.broadcast %8 : vector<1x128xf32> to vector<8x128xf32>
    %171 = arith.addf %169, %170 : vector<8x128xf32>
    %172 = vector.extract_strided_slice %171 {offsets = [0, 0], sizes = [8, 96], strides = [1, 1]} : vector<8x128xf32> to vector<8x96xf32>
    %173 = arith.negf %172 : vector<8x96xf32>
    %174 = math.exp %173 : vector<8x96xf32>
    %cst_32 = arith.constant 1.000000e+00 : f32
    %175 = vector.broadcast %cst_32 : f32 to vector<8x96xf32>
    %176 = arith.addf %175, %174 : vector<8x96xf32>
    %177 = arith.divf %175, %176 : vector<8x96xf32>
    %178 = vector.extract_strided_slice %177 {offsets = [0, 0], sizes = [8, 32], strides = [1, 1]} : vector<8x96xf32> to vector<8x32xf32>
    %179 = vector.extract_strided_slice %177 {offsets = [0, 32], sizes = [8, 32], strides = [1, 1]} : vector<8x96xf32> to vector<8x32xf32>
    %180 = vector.extract_strided_slice %177 {offsets = [0, 64], sizes = [8, 32], strides = [1, 1]} : vector<8x96xf32> to vector<8x32xf32>
    %181 = vector.extract_strided_slice %171 {offsets = [0, 96], sizes = [8, 32], strides = [1, 1]} : vector<8x128xf32> to vector<8x32xf32>
    %182 = math.tanh %181 : vector<8x32xf32>
    %183 = arith.mulf %179, %146 : vector<8x32xf32>
    %184 = arith.mulf %178, %182 : vector<8x32xf32>
    %185 = arith.addf %183, %184 : vector<8x32xf32>
    %186 = math.tanh %185 : vector<8x32xf32>
    %187 = arith.mulf %180, %186 : vector<8x32xf32>
    %188 = vector.extract_strided_slice %5 {offsets = [40, 0], sizes = [8, 128], strides = [1, 1]} : vector<64x128xf32> to vector<8x128xf32>
    %cst_33 = arith.constant dense<0.000000e+00> : vector<8x128xf32>
    %189 = tpu.matmul %167, %6, %cst_33 {dimension_numbers = #tpu.dot_dimension_numbers<[1], [0], [0], [1], [0, 0, 1, 1], [], []>} : vector<8x32xf32>, vector<32x128xf32>, vector<8x128xf32> -> vector<8x128xf32>
    %190 = arith.addf %188, %189 : vector<8x128xf32>
    %191 = vector.extract_strided_slice %190 {offsets = [0, 0], sizes = [8, 96], strides = [1, 1]} : vector<8x128xf32> to vector<8x96xf32>
    %192 = arith.negf %191 : vector<8x96xf32>
    %193 = math.exp %192 : vector<8x96xf32>
    %cst_34 = arith.constant 1.000000e+00 : f32
    %194 = vector.broadcast %cst_34 : f32 to vector<8x96xf32>
    %195 = arith.addf %194, %193 : vector<8x96xf32>
    %196 = arith.divf %194, %195 : vector<8x96xf32>
    %197 = vector.extract_strided_slice %196 {offsets = [0, 0], sizes = [8, 32], strides = [1, 1]} : vector<8x96xf32> to vector<8x32xf32>
    %198 = vector.extract_strided_slice %196 {offsets = [0, 32], sizes = [8, 32], strides = [1, 1]} : vector<8x96xf32> to vector<8x32xf32>
    %199 = vector.extract_strided_slice %196 {offsets = [0, 64], sizes = [8, 32], strides = [1, 1]} : vector<8x96xf32> to vector<8x32xf32>
    %200 = vector.extract_strided_slice %190 {offsets = [0, 96], sizes = [8, 32], strides = [1, 1]} : vector<8x128xf32> to vector<8x32xf32>
    %201 = math.tanh %200 : vector<8x32xf32>
    %202 = arith.mulf %198, %165 : vector<8x32xf32>
    %203 = arith.mulf %197, %201 : vector<8x32xf32>
    %204 = arith.addf %202, %203 : vector<8x32xf32>
    %205 = math.tanh %204 : vector<8x32xf32>
    %206 = arith.mulf %199, %205 : vector<8x32xf32>
    %207 = tpu.concatenate %167, %187 in 1 : vector<8x32xf32>, vector<8x32xf32> -> vector<8x64xf32>
    %cst_35 = arith.constant dense<0.000000e+00> : vector<8x128xf32>
    %208 = tpu.matmul %207, %7, %cst_35 {dimension_numbers = #tpu.dot_dimension_numbers<[1], [0], [0], [1], [0, 0, 1, 1], [], []>} : vector<8x64xf32>, vector<64x128xf32>, vector<8x128xf32> -> vector<8x128xf32>
    %209 = vector.broadcast %8 : vector<1x128xf32> to vector<8x128xf32>
    %210 = arith.addf %208, %209 : vector<8x128xf32>
    %211 = vector.extract_strided_slice %210 {offsets = [0, 0], sizes = [8, 96], strides = [1, 1]} : vector<8x128xf32> to vector<8x96xf32>
    %212 = arith.negf %211 : vector<8x96xf32>
    %213 = math.exp %212 : vector<8x96xf32>
    %cst_36 = arith.constant 1.000000e+00 : f32
    %214 = vector.broadcast %cst_36 : f32 to vector<8x96xf32>
    %215 = arith.addf %214, %213 : vector<8x96xf32>
    %216 = arith.divf %214, %215 : vector<8x96xf32>
    %217 = vector.extract_strided_slice %216 {offsets = [0, 0], sizes = [8, 32], strides = [1, 1]} : vector<8x96xf32> to vector<8x32xf32>
    %218 = vector.extract_strided_slice %216 {offsets = [0, 32], sizes = [8, 32], strides = [1, 1]} : vector<8x96xf32> to vector<8x32xf32>
    %219 = vector.extract_strided_slice %216 {offsets = [0, 64], sizes = [8, 32], strides = [1, 1]} : vector<8x96xf32> to vector<8x32xf32>
    %220 = vector.extract_strided_slice %210 {offsets = [0, 96], sizes = [8, 32], strides = [1, 1]} : vector<8x128xf32> to vector<8x32xf32>
    %221 = math.tanh %220 : vector<8x32xf32>
    %222 = arith.mulf %218, %185 : vector<8x32xf32>
    %223 = arith.mulf %217, %221 : vector<8x32xf32>
    %224 = arith.addf %222, %223 : vector<8x32xf32>
    %225 = math.tanh %224 : vector<8x32xf32>
    %226 = arith.mulf %219, %225 : vector<8x32xf32>
    %227 = vector.extract_strided_slice %5 {offsets = [48, 0], sizes = [8, 128], strides = [1, 1]} : vector<64x128xf32> to vector<8x128xf32>
    %cst_37 = arith.constant dense<0.000000e+00> : vector<8x128xf32>
    %228 = tpu.matmul %206, %6, %cst_37 {dimension_numbers = #tpu.dot_dimension_numbers<[1], [0], [0], [1], [0, 0, 1, 1], [], []>} : vector<8x32xf32>, vector<32x128xf32>, vector<8x128xf32> -> vector<8x128xf32>
    %229 = arith.addf %227, %228 : vector<8x128xf32>
    %230 = vector.extract_strided_slice %229 {offsets = [0, 0], sizes = [8, 96], strides = [1, 1]} : vector<8x128xf32> to vector<8x96xf32>
    %231 = arith.negf %230 : vector<8x96xf32>
    %232 = math.exp %231 : vector<8x96xf32>
    %cst_38 = arith.constant 1.000000e+00 : f32
    %233 = vector.broadcast %cst_38 : f32 to vector<8x96xf32>
    %234 = arith.addf %233, %232 : vector<8x96xf32>
    %235 = arith.divf %233, %234 : vector<8x96xf32>
    %236 = vector.extract_strided_slice %235 {offsets = [0, 0], sizes = [8, 32], strides = [1, 1]} : vector<8x96xf32> to vector<8x32xf32>
    %237 = vector.extract_strided_slice %235 {offsets = [0, 32], sizes = [8, 32], strides = [1, 1]} : vector<8x96xf32> to vector<8x32xf32>
    %238 = vector.extract_strided_slice %235 {offsets = [0, 64], sizes = [8, 32], strides = [1, 1]} : vector<8x96xf32> to vector<8x32xf32>
    %239 = vector.extract_strided_slice %229 {offsets = [0, 96], sizes = [8, 32], strides = [1, 1]} : vector<8x128xf32> to vector<8x32xf32>
    %240 = math.tanh %239 : vector<8x32xf32>
    %241 = arith.mulf %237, %204 : vector<8x32xf32>
    %242 = arith.mulf %236, %240 : vector<8x32xf32>
    %243 = arith.addf %241, %242 : vector<8x32xf32>
    %244 = math.tanh %243 : vector<8x32xf32>
    %245 = arith.mulf %238, %244 : vector<8x32xf32>
    %246 = tpu.concatenate %206, %226 in 1 : vector<8x32xf32>, vector<8x32xf32> -> vector<8x64xf32>
    %cst_39 = arith.constant dense<0.000000e+00> : vector<8x128xf32>
    %247 = tpu.matmul %246, %7, %cst_39 {dimension_numbers = #tpu.dot_dimension_numbers<[1], [0], [0], [1], [0, 0, 1, 1], [], []>} : vector<8x64xf32>, vector<64x128xf32>, vector<8x128xf32> -> vector<8x128xf32>
    %248 = vector.broadcast %8 : vector<1x128xf32> to vector<8x128xf32>
    %249 = arith.addf %247, %248 : vector<8x128xf32>
    %250 = vector.extract_strided_slice %249 {offsets = [0, 0], sizes = [8, 96], strides = [1, 1]} : vector<8x128xf32> to vector<8x96xf32>
    %251 = arith.negf %250 : vector<8x96xf32>
    %252 = math.exp %251 : vector<8x96xf32>
    %cst_40 = arith.constant 1.000000e+00 : f32
    %253 = vector.broadcast %cst_40 : f32 to vector<8x96xf32>
    %254 = arith.addf %253, %252 : vector<8x96xf32>
    %255 = arith.divf %253, %254 : vector<8x96xf32>
    %256 = vector.extract_strided_slice %255 {offsets = [0, 0], sizes = [8, 32], strides = [1, 1]} : vector<8x96xf32> to vector<8x32xf32>
    %257 = vector.extract_strided_slice %255 {offsets = [0, 32], sizes = [8, 32], strides = [1, 1]} : vector<8x96xf32> to vector<8x32xf32>
    %258 = vector.extract_strided_slice %255 {offsets = [0, 64], sizes = [8, 32], strides = [1, 1]} : vector<8x96xf32> to vector<8x32xf32>
    %259 = vector.extract_strided_slice %249 {offsets = [0, 96], sizes = [8, 32], strides = [1, 1]} : vector<8x128xf32> to vector<8x32xf32>
    %260 = math.tanh %259 : vector<8x32xf32>
    %261 = arith.mulf %257, %224 : vector<8x32xf32>
    %262 = arith.mulf %256, %260 : vector<8x32xf32>
    %263 = arith.addf %261, %262 : vector<8x32xf32>
    %264 = math.tanh %263 : vector<8x32xf32>
    %265 = arith.mulf %258, %264 : vector<8x32xf32>
    %266 = vector.extract_strided_slice %5 {offsets = [56, 0], sizes = [8, 128], strides = [1, 1]} : vector<64x128xf32> to vector<8x128xf32>
    %cst_41 = arith.constant dense<0.000000e+00> : vector<8x128xf32>
    %267 = tpu.matmul %245, %6, %cst_41 {dimension_numbers = #tpu.dot_dimension_numbers<[1], [0], [0], [1], [0, 0, 1, 1], [], []>} : vector<8x32xf32>, vector<32x128xf32>, vector<8x128xf32> -> vector<8x128xf32>
    %268 = arith.addf %266, %267 : vector<8x128xf32>
    %269 = vector.extract_strided_slice %268 {offsets = [0, 0], sizes = [8, 96], strides = [1, 1]} : vector<8x128xf32> to vector<8x96xf32>
    %270 = arith.negf %269 : vector<8x96xf32>
    %271 = math.exp %270 : vector<8x96xf32>
    %cst_42 = arith.constant 1.000000e+00 : f32
    %272 = vector.broadcast %cst_42 : f32 to vector<8x96xf32>
    %273 = arith.addf %272, %271 : vector<8x96xf32>
    %274 = arith.divf %272, %273 : vector<8x96xf32>
    %275 = vector.extract_strided_slice %274 {offsets = [0, 0], sizes = [8, 32], strides = [1, 1]} : vector<8x96xf32> to vector<8x32xf32>
    %276 = vector.extract_strided_slice %274 {offsets = [0, 32], sizes = [8, 32], strides = [1, 1]} : vector<8x96xf32> to vector<8x32xf32>
    %277 = vector.extract_strided_slice %274 {offsets = [0, 64], sizes = [8, 32], strides = [1, 1]} : vector<8x96xf32> to vector<8x32xf32>
    %278 = vector.extract_strided_slice %268 {offsets = [0, 96], sizes = [8, 32], strides = [1, 1]} : vector<8x128xf32> to vector<8x32xf32>
    %279 = math.tanh %278 : vector<8x32xf32>
    %280 = arith.mulf %276, %243 : vector<8x32xf32>
    %281 = arith.mulf %275, %279 : vector<8x32xf32>
    %282 = arith.addf %280, %281 : vector<8x32xf32>
    %283 = math.tanh %282 : vector<8x32xf32>
    %284 = arith.mulf %277, %283 : vector<8x32xf32>
    %285 = tpu.concatenate %245, %265 in 1 : vector<8x32xf32>, vector<8x32xf32> -> vector<8x64xf32>
    %cst_43 = arith.constant dense<0.000000e+00> : vector<8x128xf32>
    %286 = tpu.matmul %285, %7, %cst_43 {dimension_numbers = #tpu.dot_dimension_numbers<[1], [0], [0], [1], [0, 0, 1, 1], [], []>} : vector<8x64xf32>, vector<64x128xf32>, vector<8x128xf32> -> vector<8x128xf32>
    %287 = vector.broadcast %8 : vector<1x128xf32> to vector<8x128xf32>
    %288 = arith.addf %286, %287 : vector<8x128xf32>
    %289 = vector.extract_strided_slice %288 {offsets = [0, 0], sizes = [8, 96], strides = [1, 1]} : vector<8x128xf32> to vector<8x96xf32>
    %290 = arith.negf %289 : vector<8x96xf32>
    %291 = math.exp %290 : vector<8x96xf32>
    %cst_44 = arith.constant 1.000000e+00 : f32
    %292 = vector.broadcast %cst_44 : f32 to vector<8x96xf32>
    %293 = arith.addf %292, %291 : vector<8x96xf32>
    %294 = arith.divf %292, %293 : vector<8x96xf32>
    %295 = vector.extract_strided_slice %294 {offsets = [0, 0], sizes = [8, 32], strides = [1, 1]} : vector<8x96xf32> to vector<8x32xf32>
    %296 = vector.extract_strided_slice %294 {offsets = [0, 32], sizes = [8, 32], strides = [1, 1]} : vector<8x96xf32> to vector<8x32xf32>
    %297 = vector.extract_strided_slice %294 {offsets = [0, 64], sizes = [8, 32], strides = [1, 1]} : vector<8x96xf32> to vector<8x32xf32>
    %298 = vector.extract_strided_slice %288 {offsets = [0, 96], sizes = [8, 32], strides = [1, 1]} : vector<8x128xf32> to vector<8x32xf32>
    %299 = math.tanh %298 : vector<8x32xf32>
    %300 = arith.mulf %296, %263 : vector<8x32xf32>
    %301 = arith.mulf %295, %299 : vector<8x32xf32>
    %302 = arith.addf %300, %301 : vector<8x32xf32>
    %303 = math.tanh %302 : vector<8x32xf32>
    %304 = arith.mulf %297, %303 : vector<8x32xf32>
    %305 = tpu.concatenate %284, %304 in 1 : vector<8x32xf32>, vector<8x32xf32> -> vector<8x64xf32>
    %cst_45 = arith.constant dense<0.000000e+00> : vector<8x128xf32>
    %306 = tpu.matmul %305, %7, %cst_45 {dimension_numbers = #tpu.dot_dimension_numbers<[1], [0], [0], [1], [0, 0, 1, 1], [], []>} : vector<8x64xf32>, vector<64x128xf32>, vector<8x128xf32> -> vector<8x128xf32>
    %307 = vector.broadcast %8 : vector<1x128xf32> to vector<8x128xf32>
    %308 = arith.addf %306, %307 : vector<8x128xf32>
    %309 = vector.extract_strided_slice %308 {offsets = [0, 0], sizes = [8, 96], strides = [1, 1]} : vector<8x128xf32> to vector<8x96xf32>
    %310 = arith.negf %309 : vector<8x96xf32>
    %311 = math.exp %310 : vector<8x96xf32>
    %cst_46 = arith.constant 1.000000e+00 : f32
    %312 = vector.broadcast %cst_46 : f32 to vector<8x96xf32>
    %313 = arith.addf %312, %311 : vector<8x96xf32>
    %314 = arith.divf %312, %313 : vector<8x96xf32>
    %315 = vector.extract_strided_slice %314 {offsets = [0, 0], sizes = [8, 32], strides = [1, 1]} : vector<8x96xf32> to vector<8x32xf32>
    %316 = vector.extract_strided_slice %314 {offsets = [0, 32], sizes = [8, 32], strides = [1, 1]} : vector<8x96xf32> to vector<8x32xf32>
    %317 = vector.extract_strided_slice %314 {offsets = [0, 64], sizes = [8, 32], strides = [1, 1]} : vector<8x96xf32> to vector<8x32xf32>
    %318 = vector.extract_strided_slice %308 {offsets = [0, 96], sizes = [8, 32], strides = [1, 1]} : vector<8x128xf32> to vector<8x32xf32>
    %319 = math.tanh %318 : vector<8x32xf32>
    %320 = arith.mulf %316, %302 : vector<8x32xf32>
    %321 = arith.mulf %315, %319 : vector<8x32xf32>
    %322 = arith.addf %320, %321 : vector<8x32xf32>
    %323 = math.tanh %322 : vector<8x32xf32>
    %324 = arith.mulf %317, %323 : vector<8x32xf32>
    %325 = tpu.concatenate %284, %324 in 0 : vector<8x32xf32>, vector<8x32xf32> -> vector<16x32xf32>
    %c0_47 = arith.constant 0 : index
    %c0_48 = arith.constant 0 : index
    %326 = vector.load %arg6[%c0_47, %c0_48] : memref<32x4xf32, #tpu.memory_space<vmem>>, vector<32x4xf32>
    %cst_49 = arith.constant dense<0.000000e+00> : vector<16x4xf32>
    %327 = tpu.matmul %325, %326, %cst_49 {dimension_numbers = #tpu.dot_dimension_numbers<[1], [0], [0], [1], [0, 0, 1, 1], [], []>} : vector<16x32xf32>, vector<32x4xf32>, vector<16x4xf32> -> vector<16x4xf32>
    %c0_50 = arith.constant 0 : index
    %c0_51 = arith.constant 0 : index
    %328 = vector.load %arg7[%c0_50, %c0_51] : memref<1x4xf32, #tpu.memory_space<vmem>>, vector<1x4xf32>
    %329 = vector.broadcast %328 : vector<1x4xf32> to vector<16x4xf32>
    %330 = arith.addf %327, %329 : vector<16x4xf32>
    %331 = arith.negf %330 : vector<16x4xf32>
    %332 = math.exp %331 : vector<16x4xf32>
    %cst_52 = arith.constant 1.000000e+00 : f32
    %333 = vector.broadcast %cst_52 : f32 to vector<16x4xf32>
    %334 = arith.addf %333, %332 : vector<16x4xf32>
    %335 = arith.divf %333, %334 : vector<16x4xf32>
    %c0_53 = arith.constant 0 : index
    %c0_54 = arith.constant 0 : index
    %336 = vector.load %arg8[%c0_53, %c0_54] : memref<16x4xf32, #tpu.memory_space<vmem>>, vector<16x4xf32>
    tpu.vector_store %arg8[%c0_53, %c0_54], %335 {strides = array<i32>} : memref<16x4xf32, #tpu.memory_space<vmem>>, vector<16x4xf32>,
    return
  }
}

</mosaic_0001>

<bundles_post_ra>
// kernel: tpu_custom_call.1
= control target key start
LH: loop header
LB: loop body
LE: loop exit
PB: predicated region body
PF: predicated region fallthrough
CT: control target
= control target key end

     0   :  { %v2522_v0 = vmov 0.0   ;;  %vm2523_vm0 = vmmov 0   ;;  %vm46_vm1 = vcmask 130048   ;;  %s2524_s21 = smov 32   ;;  %s2525_s26 = smov 64   ;;  %vm189_vm2 = vcmask 261120   ;;  %s3124_s1 = inlined_call_operand.vmem [shape: f32[16,128], index: 1, kind: input, shape index: {}]   ;;  %s3125_s2 = inlined_call_operand.vmem [shape: f32[32,128], index: 2, kind: input, shape index: {}]   ;;  %s3126_s0 = inlined_call_operand.vmem [shape: f32[64,16], index: 0, kind: input, shape index: {}]   ;;  %s3127_s3 = inlined_call_operand.vmem [shape: f32[1,128], index: 3, kind: input, shape index: {}]   ;;  %s3128_s4 = inlined_call_operand.vmem [shape: f32[64,128], index: 4, kind: input, shape index: {}]   ;;  %s3129_s5 = inlined_call_operand.vmem [shape: f32[1,128], index: 5, kind: input, shape index: {}]   ;;  %s3130_s6 = inlined_call_operand.vmem [shape: f32[32,4], index: 6, kind: input, shape index: {}]   ;;  %s3131_s7 = inlined_call_operand.vmem [shape: f32[1,4], index: 7, kind: input, shape index: {}]   ;;  %s3132_s8 = inlined_call_operand.vmem [shape: f32[16,4], index: 8, kind: output, shape index: {}]  }
   0x1   :  { %2120 = vmatprep.subr.mxu1 %v2522_v0  ;;  %v38_v1 = vld [vmem:[%s3124_s1 + $0x8] sm:$0xff]  ;;  %v2579_v2 = vld [vmem:[%s3125_s2 + $0x18] sm:$0xff]  ;;  %v37_v3 = vld [vmem:[%s3124_s1] sm:$0xff]  ;;  %2128 = vmatprep.mubr.msk.f32.mxu1 %vm2523_vm0, %v2522_v0  ;;  %vm396_vm3 = vcmask 523264   ;;  %s2526_s29 = smov 96   ;;  %vm1923_vm4 = vcmask 31744  }
   0x2   :  { %2104 = vmatprep.subr.mxu0 %v38_v1  ;;  %2121 = vmatpush3.msra.mxu1 %v2579_v2  ;;  %v2590_v4 = vld [vmem:[%s3125_s2 + $0x10] sm:$0xff]  ;;  %v29_v5 = vld [vmem:[%s3126_s0] sm:$0xff]  ;;  %v30_v6 = vld [vmem:[%s3126_s0 + $0x8] sm:$0xff] }
   0x3   :  { %2105 = vmatpush3.msra.mxu0 %v38_v1  ;;  %2122 = vmatprep.subr.mxu1 %v2522_v0  ;;  %v2603_v7 = vld [vmem:[%s3125_s2 + $0x8] sm:$0xff]  ;;  %v2611_v8 = vld [vmem:[%s3125_s2] sm:$0xff]  ;;  %v31_v26 = vld [vmem:[%s3126_s0 + $0x10] sm:$0xff] }
   0x4   :  { %2106 = vmatprep.subr.mxu0 %v37_v3  ;;  %2123 = vmatpush3.msra.mxu1 %v2590_v4  ;;  %v2634_v10 = vld [vmem:[%s3127_s3] ss:$0 sm:$0xff]  ;;  %v32_v27 = vld [vmem:[%s3126_s0 + $0x18] sm:$0xff]  ;;  %v2657_v29 = vld [vmem:[%s3128_s4 + $0x30] sm:$0xff] }
   0x5   :  { %2107 = vmatpush3.msra.mxu0 %v37_v3  ;;  %2108 = vmatprep.mubr.msk.f32.mxu0 %vm46_vm1, %v29_v5  ;;  %v2651_v28 = vld [vmem:[%s3128_s4 + $0x38] sm:$0xff]  ;;  %v33_v30 = vld [vmem:[%s3126_s0 + $0x20] sm:$0xff]  ;;  %v2668_v31 = vld [vmem:[%s3128_s4 + $0x28] sm:$0xff] }
   0x6   :  { %2124 = vmatprep.subr.mxu1 %v2522_v0  ;;  %2109 = vmatmul.mubr.msk.f32.vlgmr.msra.gmra.mxu0 %vm46_vm1, %v30_v6  ;;  %v34_v32 = vld [vmem:[%s3126_s0 + $0x28] sm:$0xff]  ;;  %v2679_v33 = vld [vmem:[%s3128_s4 + $0x20] sm:$0xff]  ;;  %v35_v34 = vld [vmem:[%s3126_s0 + $0x30] sm:$0xff] }
   0x7   :  { %2125 = vmatpush3.msra.mxu1 %v2603_v7  ;;  %2142 = vmatprep.subr.mxu0 %v2522_v0  ;;  %v2690_v35 = vld [vmem:[%s3128_s4 + $0x18] sm:$0xff]  ;;  %v2698_v36 = vld [vmem:[%s3128_s4 + $0x10] sm:$0xff]  ;;  %v2709_v39 = vld [vmem:[%s3128_s4 + $0x8] sm:$0xff] }
   0x8   :  { %2126 = vmatprep.subr.mxu1 %v2522_v0  ;;  %2111 = vmatprep.mubr.msk.f32.mxu0 %vm46_vm1, %v31_v26  ;;  %v36_v38 = vld [vmem:[%s3126_s0 + $0x38] sm:$0xff]  ;;  %v2721_v40 = vld [vmem:[%s3128_s4] sm:$0xff] }
   0x9   :  { %2127 = vmatpush3.msra.mxu1 %v2611_v8  ;;  %2143 = vmatpush3.msra.mxu0 %v2651_v28  ;;  %v2774_v52 = vld [vmem:[%s3129_s5] ss:$0 sm:$0xff] }
   0xa   :  { %2129 = vmatmul.mubr.f32.vlgmr.msra.gmra.mxu1 %v2522_v0  ;;  %2131 = vmatprep.subr.mxu1 %v2522_v0 }
   0xb   :  { %2132 = vmatpush3.msra.mxu1 %v2579_v2  ;;  %2139 = vmatprep.mubr.msk.f32.mxu1 %vm2523_vm0, %v2522_v0 }
   0xc   :  { %2133 = vmatprep.subr.mxu1 %v2522_v0  ;;  %2144 = vmatprep.subr.mxu0 %v2522_v0 }
   0xd   :  { %2134 = vmatpush3.msra.mxu1 %v2590_v4  ;;  %2112 = vmatmul.mubr.msk.f32.gmra.mxu0 %vm46_vm1, %v32_v27 }
   0xe   :  { %2135 = vmatprep.subr.mxu1 %v2522_v0  ;;  %2145 = vmatpush3.msra.mxu0 %v2657_v29 }
   0xf   :  { %2136 = vmatpush3.msra.mxu1 %v2603_v7  ;;  %2114 = vmatprep.mubr.msk.f32.mxu0 %vm46_vm1, %v33_v30 }
  0x10   :  { %2137 = vmatprep.subr.mxu1 %v2522_v0  ;;  %2146 = vmatprep.subr.mxu0 %v2522_v0 }
  0x11   :  { %2138 = vmatpush3.msra.mxu1 %v2611_v8  ;;  %2147 = vmatpush3.msra.mxu0 %v2668_v31 }
  0x12   :  { %2161 = vmatprep.subr.mxu1 %v2522_v0  ;;  %2148 = vmatprep.subr.mxu0 %v2522_v0 }
  0x13   :  { %2115 = vmatmul.mubr.msk.f32.gmra.mxu0 %vm46_vm1, %v34_v32 }
  0x14   :  { %2149 = vmatpush3.msra.mxu0 %v2679_v33  ;;  %2117 = vmatprep.mubr.msk.f32.mxu0 %vm46_vm1, %v35_v34 }
  0x15   :  { %2150 = vmatprep.subr.mxu0 %v2522_v0 }
  0x16   :  { %2151 = vmatpush3.msra.mxu0 %v2690_v35 }
  0x17   :  { %2152 = vmatprep.subr.mxu0 %v2522_v0  ;;  %2118 = vmatmul.mubr.msk.f32.gmra.mxu0 %vm46_vm1, %v36_v38 }
  0x18   :  { %2153 = vmatpush3.msra.mxu0 %v2698_v36  ;;  %2158 = vmatprep.mubr.msk.f32.mxu0 %vm2523_vm0, %v2522_v0 }
  0x19   :  { %2154 = vmatprep.subr.mxu0 %v2522_v0 }
  0x1a   :  { %2155 = vmatpush3.msra.mxu0 %v2709_v39 }
  0x1b   :  { %2156 = vmatprep.subr.mxu0 %v2522_v0 }
  0x1c   :  { %2157 = vmatpush3.msra.mxu0 %v2721_v40 }
  0x1d   :  { %2172 = vmatprep.subr.mxu0 %v2522_v0 }
  0xc6   :  { %v2629_v9 = vpop.f32.mrf.mxu0 }
  0xc7   :  { %v143_v51 = vadd.f32 %v2629_v9, %v2634_v10 }
  0xc8   :  { %v137_v11 = vpop.f32.mrf.mxu0 }
  0xc9   :  { %v138_v12 = vadd.f32 %v2634_v10, %v137_v11 }
  0xca   :  { %v259_v13 = vpop.f32.mrf.mxu1 }
  0xcb   :  { %v263_v14 = vadd.f32 %v259_v13, %v138_v12 }
  0xcc   :  { %v2130_v15 = vpop.f32.mrf.mxu1 }
  0xcd   :  { %2376 = vtanh.f32 %v263_v14  ;;  %v1939_v17 = vmul.f32 -1.442695, %v263_v14  ;;  %v2757_v45 = vpop.f32.mrf.mxu0 }
  0xcf   :  { %2378 = vpow2.f32 %v1939_v17  ;;  %v2759_v46 = vpop.f32.mrf.mxu0 }
  0xd0   :  { %v148_v34 = vadd.f32 %v2634_v10, %v2759_v46 }
  0xd3   :  { %v2761_v47 = vpop.f32.mrf.mxu0 }
  0xd5   :  { %v2763_v48 = vpop.f32.mrf.mxu0 }
  0xd7   :  { %v2765_v49 = vpop.f32.mrf.mxu0 }
  0xd9   :  { %v2767_v50 = vpop.f32.mrf.mxu0 }
  0xda   :  { %v2377_v16 = vpop.eup %2376 }
  0xdb   :  { %273 = vrot.lane.b32.xlu0 %v2377_v16, %s2524_s21 }
  0xdc   :  { %v2379_v18 = vpop.eup %2378 }
  0xdd   :  { %v267_v19 = vadd.f32 1.0, %v2379_v18 }
  0xdf   :  { %2380 = vrcp.f32 %v267_v19 }
  0xec   :  { %v2381_v20 = vpop.eup %2380 }
  0xed   :  { %v271_v23 = vmul.f32 0.0, %v2381_v20 }
 0x14d   :  { %v274_v21 = vpop.permute.xlu0 %273 }
 0x14e   :  { %v276_v22 = vmul.f32 %v2381_v20, %v274_v21 }
 0x150   :  { %278 = vrot.lane.b32.xlu0 %v276_v22, %s2524_s21 }
 0x1c2   :  { %v279_v24 = vpop.permute.xlu0 %278 }
 0x1c3   :  { %v2639_v25 = vadd.f32 %v279_v24, %v271_v23 }
 0x1c5   :  { %2382 = vtanh.f32 %v2639_v25 }
 0x1d2   :  { %v2383_v37 = vpop.eup %2382 }
 0x1d3   :  { %284 = vrot.lane.b32.xlu1 %v2383_v37, %s2524_s21 }
 0x245   :  { %v285_v41 = vpop.permute.xlu1 %284 }
 0x246   :  { %v287_v42 = vmul.f32 %v2381_v20, %v285_v41 }
 0x248   :  { %289 = vrot.lane.b32.xlu1 %v287_v42, %s2525_s26 }
 0x2ba   :  { %v290_v43 = vpop.permute.xlu1 %289 }
 0x2bb   :  { %v389_v44 = vsel %vm189_vm2, %v290_v43, 0.0  ;;  %2140 = vmatmul.mubr.msk.f32.vlgmr.msra.gmra.mxu1 %vm189_vm2, %v290_v43 }
 0x2bc   :  { %2159 = vmatmul.mubr.msk.f32.vlgmr.msra.gmra.mxu0 %vm396_vm3, %v389_v44  ;;  %2162 = vmatpush3.msra.mxu1 %v2579_v2 }
 0x2bd   :  { %2173 = vmatpush3.msra.mxu0 %v2651_v28  ;;  %2163 = vmatprep.subr.mxu1 %v2522_v0 }
 0x2be   :  { %2174 = vmatprep.subr.mxu0 %v2522_v0  ;;  %2164 = vmatpush3.msra.mxu1 %v2590_v4 }
 0x2bf   :  { %2175 = vmatpush3.msra.mxu0 %v2657_v29  ;;  %2165 = vmatprep.subr.mxu1 %v2522_v0 }
 0x2c0   :  { %2176 = vmatprep.subr.mxu0 %v2522_v0  ;;  %2166 = vmatpush3.msra.mxu1 %v2603_v7 }
 0x2c1   :  { %2177 = vmatpush3.msra.mxu0 %v2668_v31  ;;  %2167 = vmatprep.subr.mxu1 %v2522_v0 }
 0x2c2   :  { %2178 = vmatprep.subr.mxu0 %v2522_v0  ;;  %2168 = vmatpush3.msra.mxu1 %v2611_v8 }
 0x2c3   :  { %2179 = vmatpush3.msra.mxu0 %v2679_v33  ;;  %2169 = vmatprep.mubr.msk.f32.mxu1 %vm2523_vm0, %v2522_v0 }
 0x2c4   :  { %2180 = vmatprep.subr.mxu0 %v2522_v0  ;;  %2188 = vmatprep.mubr.msk.f32.mxu0 %vm2523_vm0, %v2522_v0 }
 0x2c5   :  { %2181 = vmatpush3.msra.mxu0 %v2690_v35  ;;  %2191 = vmatprep.subr.mxu1 %v2522_v0 }
 0x2c6   :  { %2182 = vmatprep.subr.mxu0 %v2522_v0 }
 0x2c7   :  { %2183 = vmatpush3.msra.mxu0 %v2698_v36 }
 0x2c8   :  { %2184 = vmatprep.subr.mxu0 %v2522_v0 }
 0x2c9   :  { %2185 = vmatpush3.msra.mxu0 %v2709_v39 }
 0x2ca   :  { %2186 = vmatprep.subr.mxu0 %v2522_v0 }
 0x2cb   :  { %2187 = vmatpush3.msra.mxu0 %v2721_v40 }
 0x2cc   :  { %2221 = vmatprep.subr.mxu0 %v2522_v0 }
 0x37b   :  { %v359_v53 = vpop.f32.mrf.mxu1 }
 0x37c   :  { %v363_v54 = vadd.f32 %v359_v53, %v143_v51  ;;  %v466_v55 = vpop.f32.mrf.mxu0 }
 0x37d   :  { %v467_v56 = vadd.f32 %v2774_v52, %v466_v55  ;;  %v2141_v57 = vpop.f32.mrf.mxu1 }
 0x37e   :  { %2384 = vtanh.f32 %v363_v54  ;;  %v2160_v58 = vpop.f32.mrf.mxu0  ;;  %v1941_v61 = vmul.f32 -1.442695, %v363_v54 }
 0x37f   :  { %2386 = vtanh.f32 %v467_v56  ;;  %v1944_v62 = vmul.f32 -1.442695, %v467_v56 }
 0x380   :  { %2388 = vpow2.f32 %v1941_v61 }
 0x381   :  { %2390 = vpow2.f32 %v1944_v62 }
 0x38b   :  { %v2385_v59 = vpop.eup %2384 }
 0x38c   :  { %v2387_v60 = vpop.eup %2386  ;;  %373 = vrot.lane.b32.xlu0 %v2385_v59, %s2524_s21 }
 0x38d   :  { %479 = vrot.lane.b32.xlu1 %v2387_v60, %s2524_s21  ;;  %v2389_v63 = vpop.eup %2388 }
 0x38e   :  { %v2391_v1 = vpop.eup %2390  ;;  %v367_v3 = vadd.f32 1.0, %v2389_v63 }
 0x38f   :  { %v473_v5 = vadd.f32 1.0, %v2391_v1 }
 0x390   :  { %2392 = vrcp.f32 %v367_v3 }
 0x391   :  { %2394 = vrcp.f32 %v473_v5 }
 0x39d   :  { %v2393_v6 = vpop.eup %2392 }
 0x39e   :  { %v2395_v11 = vpop.eup %2394  ;;  %v371_v15 = vmul.f32 %v2393_v6, %v2639_v25 }
 0x39f   :  { %v477_v17 = vmul.f32 0.0, %v2395_v11 }
 0x3fe   :  { %v374_v9 = vpop.permute.xlu0 %373 }
 0x3ff   :  { %v376_v12 = vmul.f32 %v2393_v6, %v374_v9  ;;  %v480_v13 = vpop.permute.xlu1 %479 }
 0x400   :  { %v482_v14 = vmul.f32 %v2395_v11, %v480_v13 }
 0x401   :  { %378 = vrot.lane.b32.xlu0 %v376_v12, %s2524_s21 }
 0x402   :  { %484 = vrot.lane.b32.xlu1 %v482_v14, %s2524_s21 }
 0x473   :  { %v379_v16 = vpop.permute.xlu0 %378 }
 0x474   :  { %v2782_v18 = vadd.f32 %v379_v16, %v371_v15  ;;  %v485_v19 = vpop.permute.xlu1 %484 }
 0x475   :  { %v2784_v20 = vadd.f32 %v485_v19, %v477_v17 }
 0x476   :  { %2396 = vtanh.f32 %v2782_v18 }
 0x477   :  { %2398 = vtanh.f32 %v2784_v20 }
 0x483   :  { %v2397_v21 = vpop.eup %2396 }
 0x484   :  { %v2399_v22 = vpop.eup %2398  ;;  %384 = vrot.lane.b32.xlu0 %v2397_v21, %s2524_s21 }
 0x485   :  { %490 = vrot.lane.b32.xlu1 %v2399_v22, %s2524_s21  ;;  %v153_v22 = vadd.f32 %v2757_v45, %v2634_v10 }
 0x4f6   :  { %v385_v23 = vpop.permute.xlu0 %384 }
 0x4f7   :  { %v387_v24 = vmul.f32 %v2393_v6, %v385_v23  ;;  %v491_v25 = vpop.permute.xlu1 %490 }
 0x4f8   :  { %v493_v26 = vmul.f32 %v2395_v11, %v491_v25 }
 0x4f9   :  { %495 = vrot.lane.b32.xlu0 %v387_v24, %s2525_s26 }
 0x4fa   :  { %596 = vrot.lane.b32.xlu1 %v493_v26, %s2526_s29 }
 0x56b   :  { %v496_v27 = vpop.permute.xlu0 %495 }
 0x56c   :  { %2170 = vmatmul.mubr.msk.f32.vlgmr.msra.gmra.mxu1 %vm189_vm2, %v496_v27  ;;  %v597_v30 = vpop.permute.xlu1 %596 }
 0x56d   :  { %v599_v32 = vsel %vm189_vm2, %v496_v27, %v597_v30  ;;  %2192 = vmatpush3.msra.mxu1 %v2579_v2  ;;  %2199 = vmatprep.mubr.msk.f32.mxu1 %vm2523_vm0, %v2522_v0 }
 0x56e   :  { %2189 = vmatmul.mubr.msk.f32.vlgmr.msra.gmra.mxu0 %vm396_vm3, %v599_v32  ;;  %2193 = vmatprep.subr.mxu1 %v2522_v0 }
 0x56f   :  { %2194 = vmatpush3.msra.mxu1 %v2590_v4  ;;  %2222 = vmatpush3.msra.mxu0 %v2579_v2 }
 0x570   :  { %2195 = vmatprep.subr.mxu1 %v2522_v0  ;;  %2223 = vmatprep.subr.mxu0 %v2522_v0 }
 0x571   :  { %2196 = vmatpush3.msra.mxu1 %v2603_v7  ;;  %2224 = vmatpush3.msra.mxu0 %v2590_v4 }
 0x572   :  { %2197 = vmatprep.subr.mxu1 %v2522_v0  ;;  %2225 = vmatprep.subr.mxu0 %v2522_v0 }
 0x573   :  { %2198 = vmatpush3.msra.mxu1 %v2611_v8  ;;  %2226 = vmatpush3.msra.mxu0 %v2603_v7 }
 0x574   :  { %2202 = vmatprep.subr.mxu1 %v2522_v0  ;;  %2227 = vmatprep.subr.mxu0 %v2522_v0 }
 0x575   :  { %2228 = vmatpush3.msra.mxu0 %v2611_v8  ;;  %2229 = vmatprep.mubr.msk.f32.mxu0 %vm2523_vm0, %v2522_v0 }
 0x576   :  { %2232 = vmatprep.subr.mxu0 %v2522_v0 }
 0x62c   :  { %v565_v37 = vpop.f32.mrf.mxu1 }
 0x62d   :  { %v569_v38 = vadd.f32 %v565_v37, %v148_v34 }
 0x62e   :  { %v2171_v41 = vpop.f32.mrf.mxu1  ;;  %v669_v42 = vpop.f32.mrf.mxu0 }
 0x62f   :  { %2400 = vtanh.f32 %v569_v38  ;;  %v670_v43 = vadd.f32 %v2774_v52, %v669_v42  ;;  %v1946_v54 = vmul.f32 -1.442695, %v569_v38 }
 0x630   :  { %v2190_v44 = vpop.f32.mrf.mxu0 }
 0x631   :  { %2402 = vtanh.f32 %v670_v43  ;;  %v1948_v55 = vmul.f32 -1.442695, %v670_v43 }
 0x632   :  { %2404 = vpow2.f32 %v1946_v54 }
 0x633   :  { %2406 = vpow2.f32 %v1948_v55 }
 0x63c   :  { %v2401_v51 = vpop.eup %2400 }
 0x63d   :  { %579 = vrot.lane.b32.xlu0 %v2401_v51, %s2524_s21 }
 0x63e   :  { %v2403_v53 = vpop.eup %2402 }
 0x63f   :  { %682 = vrot.lane.b32.xlu1 %v2403_v53, %s2524_s21  ;;  %v2405_v46 = vpop.eup %2404 }
 0x640   :  { %v2407_v56 = vpop.eup %2406  ;;  %v573_v57 = vadd.f32 1.0, %v2405_v46 }
 0x641   :  { %v676_v58 = vadd.f32 1.0, %v2407_v56 }
 0x642   :  { %2408 = vrcp.f32 %v573_v57 }
 0x643   :  { %2410 = vrcp.f32 %v676_v58 }
 0x64f   :  { %v2409_v59 = vpop.eup %2408 }
 0x650   :  { %v2411_v62 = vpop.eup %2410  ;;  %v577_v3 = vmul.f32 %v2409_v59, %v2782_v18 }
 0x651   :  { %v680_v9 = vmul.f32 %v2411_v62, %v2784_v20 }
 0x6af   :  { %v580_v60 = vpop.permute.xlu0 %579 }
 0x6b0   :  { %v582_v61 = vmul.f32 %v2409_v59, %v580_v60 }
 0x6b1   :  { %v683_v63 = vpop.permute.xlu1 %682 }
 0x6b2   :  { %584 = vrot.lane.b32.xlu0 %v582_v61, %s2524_s21  ;;  %v685_v1 = vmul.f32 %v2411_v62, %v683_v63 }
 0x6b4   :  { %687 = vrot.lane.b32.xlu1 %v685_v1, %s2524_s21 }
 0x724   :  { %v585_v5 = vpop.permute.xlu0 %584 }
 0x725   :  { %v2823_v6 = vadd.f32 %v585_v5, %v577_v3 }
 0x726   :  { %v688_v11 = vpop.permute.xlu1 %687 }
 0x727   :  { %2412 = vtanh.f32 %v2823_v6  ;;  %v2827_v12 = vadd.f32 %v688_v11, %v680_v9 }
 0x729   :  { %2414 = vtanh.f32 %v2827_v12 }
 0x734   :  { %v2413_v13 = vpop.eup %2412 }
 0x735   :  { %590 = vrot.lane.b32.xlu0 %v2413_v13, %s2524_s21  ;;  %v158_v13 = vadd.f32 %v2634_v10, %v2763_v48 }
 0x736   :  { %v2415_v14 = vpop.eup %2414 }
 0x737   :  { %693 = vrot.lane.b32.xlu1 %v2415_v14, %s2524_s21 }
 0x7a7   :  { %v591_v15 = vpop.permute.xlu0 %590 }
 0x7a8   :  { %v593_v16 = vmul.f32 %v2409_v59, %v591_v15 }
 0x7a9   :  { %v694_v17 = vpop.permute.xlu1 %693 }
 0x7aa   :  { %698 = vrot.lane.b32.xlu0 %v593_v16, %s2525_s26  ;;  %v696_v18 = vmul.f32 %v2411_v62, %v694_v17 }
 0x7ac   :  { %799 = vrot.lane.b32.xlu1 %v696_v18, %s2526_s29 }
 0x81c   :  { %v699_v19 = vpop.permute.xlu0 %698 }
 0x81d   :  { %2200 = vmatmul.mubr.msk.f32.vlgmr.msra.gmra.mxu1 %vm189_vm2, %v699_v19 }
 0x81e   :  { %2203 = vmatpush3.msra.mxu1 %v2651_v28  ;;  %2218 = vmatprep.mubr.msk.f32.mxu1 %vm2523_vm0, %v2522_v0  ;;  %v800_v20 = vpop.permute.xlu1 %799 }
 0x81f   :  { %2204 = vmatprep.subr.mxu1 %v2522_v0  ;;  %v802_v21 = vsel %vm189_vm2, %v699_v19, %v800_v20 }
 0x820   :  { %2205 = vmatpush3.msra.mxu1 %v2657_v29 }
 0x821   :  { %2206 = vmatprep.subr.mxu1 %v2522_v0 }
 0x822   :  { %2207 = vmatpush3.msra.mxu1 %v2668_v31 }
 0x823   :  { %2208 = vmatprep.subr.mxu1 %v2522_v0 }
 0x824   :  { %2209 = vmatpush3.msra.mxu1 %v2679_v33 }
 0x825   :  { %2210 = vmatprep.subr.mxu1 %v2522_v0 }
 0x826   :  { %2211 = vmatpush3.msra.mxu1 %v2690_v35 }
 0x827   :  { %2212 = vmatprep.subr.mxu1 %v2522_v0 }
 0x828   :  { %2213 = vmatpush3.msra.mxu1 %v2698_v36 }
 0x829   :  { %2214 = vmatprep.subr.mxu1 %v2522_v0 }
 0x82a   :  { %2215 = vmatpush3.msra.mxu1 %v2709_v39 }
 0x82b   :  { %2216 = vmatprep.subr.mxu1 %v2522_v0 }
 0x82c   :  { %2217 = vmatpush3.msra.mxu1 %v2721_v40 }
 0x82d   :  { %2219 = vmatmul.mubr.msk.f32.vlgmr.msra.gmra.mxu1 %vm396_vm3, %v802_v21  ;;  %2251 = vmatprep.subr.mxu1 %v2522_v0 }
 0x82e   :  { %2252 = vmatpush3.msra.mxu1 %v2579_v2  ;;  %2259 = vmatprep.mubr.msk.f32.mxu1 %vm2523_vm0, %v2522_v0 }
 0x82f   :  { %2253 = vmatprep.subr.mxu1 %v2522_v0 }
 0x830   :  { %2254 = vmatpush3.msra.mxu1 %v2590_v4 }
 0x831   :  { %2255 = vmatprep.subr.mxu1 %v2522_v0 }
 0x832   :  { %2256 = vmatpush3.msra.mxu1 %v2603_v7 }
 0x833   :  { %2257 = vmatprep.subr.mxu1 %v2522_v0 }
 0x834   :  { %2258 = vmatpush3.msra.mxu1 %v2611_v8 }
 0x835   :  { %2262 = vmatprep.subr.mxu1 %v2522_v0 }
 0x8dd   :  { %v768_v23 = vpop.f32.mrf.mxu1 }
 0x8de   :  { %v772_v24 = vadd.f32 %v768_v23, %v153_v22 }
 0x8df   :  { %v2201_v25 = vpop.f32.mrf.mxu1 }
 0x8e0   :  { %2416 = vtanh.f32 %v772_v24  ;;  %v1950_v37 = vmul.f32 -1.442695, %v772_v24 }
 0x8ed   :  { %v2417_v26 = vpop.eup %2416  ;;  %v872_v27 = vpop.f32.mrf.mxu1 }
 0x8ee   :  { %v873_v30 = vadd.f32 %v2774_v52, %v872_v27  ;;  %782 = vrot.lane.b32.xlu0 %v2417_v26, %s2524_s21 }
 0x8ef   :  { %v2220_v32 = vpop.f32.mrf.mxu1 }
 0x8f0   :  { %2418 = vtanh.f32 %v873_v30  ;;  %v1952_v38 = vmul.f32 -1.442695, %v873_v30 }
 0x8f1   :  { %2420 = vpow2.f32 %v1950_v37 }
 0x8f2   :  { %2422 = vpow2.f32 %v1952_v38 }
 0x8fd   :  { %v2419_v34 = vpop.eup %2418 }
 0x8fe   :  { %885 = vrot.lane.b32.xlu1 %v2419_v34, %s2524_s21  ;;  %v2421_v41 = vpop.eup %2420 }
 0x8ff   :  { %v776_v45 = vadd.f32 1.0, %v2421_v41  ;;  %v2423_v42 = vpop.eup %2422 }
 0x900   :  { %v879_v43 = vadd.f32 1.0, %v2423_v42 }
 0x901   :  { %2424 = vrcp.f32 %v776_v45 }
 0x902   :  { %2426 = vrcp.f32 %v879_v43 }
 0x90e   :  { %v2425_v44 = vpop.eup %2424 }
 0x90f   :  { %v2427_v54 = vpop.eup %2426  ;;  %v780_v56 = vmul.f32 %v2425_v44, %v2823_v6 }
 0x910   :  { %v883_v59 = vmul.f32 %v2427_v54, %v2827_v12 }
 0x960   :  { %v783_v51 = vpop.permute.xlu0 %782 }
 0x961   :  { %v785_v53 = vmul.f32 %v2425_v44, %v783_v51 }
 0x963   :  { %787 = vrot.lane.b32.xlu0 %v785_v53, %s2524_s21 }
 0x970   :  { %v886_v55 = vpop.permute.xlu1 %885 }
 0x971   :  { %v888_v46 = vmul.f32 %v2427_v54, %v886_v55 }
 0x973   :  { %890 = vrot.lane.b32.xlu1 %v888_v46, %s2524_s21 }
 0x9d5   :  { %v788_v57 = vpop.permute.xlu0 %787 }
 0x9d6   :  { %v2873_v58 = vadd.f32 %v788_v57, %v780_v56 }
 0x9d8   :  { %2428 = vtanh.f32 %v2873_v58 }
 0x9e5   :  { %v2429_v60 = vpop.eup %2428  ;;  %v891_v61 = vpop.permute.xlu1 %890 }
 0x9e6   :  { %v2877_v62 = vadd.f32 %v891_v61, %v883_v59  ;;  %793 = vrot.lane.b32.xlu0 %v2429_v60, %s2524_s21 }
 0x9e8   :  { %2430 = vtanh.f32 %v2877_v62 }
 0x9f5   :  { %v2431_v63 = vpop.eup %2430 }
 0x9f6   :  { %896 = vrot.lane.b32.xlu1 %v2431_v63, %s2524_s21 }
 0xa58   :  { %v794_v1 = vpop.permute.xlu0 %793 }
 0xa59   :  { %v796_v3 = vmul.f32 %v2425_v44, %v794_v1 }
 0xa5b   :  { %901 = vrot.lane.b32.xlu0 %v796_v3, %s2525_s26 }
 0xa68   :  { %v897_v5 = vpop.permute.xlu1 %896 }
 0xa69   :  { %v899_v6 = vmul.f32 %v2427_v54, %v897_v5 }
 0xa6b   :  { %1002 = vrot.lane.b32.xlu1 %v899_v6, %s2526_s29 }
 0xacd   :  { %v902_v9 = vpop.permute.xlu0 %901 }
 0xace   :  { %2230 = vmatmul.mubr.msk.f32.vlgmr.msra.gmra.mxu0 %vm189_vm2, %v902_v9 }
 0xacf   :  { %2233 = vmatpush3.msra.mxu0 %v2651_v28  ;;  %2248 = vmatprep.mubr.msk.f32.mxu0 %vm2523_vm0, %v2522_v0 }
 0xad0   :  { %2234 = vmatprep.subr.mxu0 %v2522_v0 }
 0xad1   :  { %2235 = vmatpush3.msra.mxu0 %v2657_v29 }
 0xad2   :  { %2236 = vmatprep.subr.mxu0 %v2522_v0 }
 0xad3   :  { %2237 = vmatpush3.msra.mxu0 %v2668_v31 }
 0xad4   :  { %2238 = vmatprep.subr.mxu0 %v2522_v0 }
 0xad5   :  { %2239 = vmatpush3.msra.mxu0 %v2679_v33 }
 0xad6   :  { %2240 = vmatprep.subr.mxu0 %v2522_v0 }
 0xad7   :  { %2241 = vmatpush3.msra.mxu0 %v2690_v35 }
 0xad8   :  { %2242 = vmatprep.subr.mxu0 %v2522_v0 }
 0xad9   :  { %2243 = vmatpush3.msra.mxu0 %v2698_v36 }
 0xada   :  { %2244 = vmatprep.subr.mxu0 %v2522_v0 }
 0xadb   :  { %2245 = vmatpush3.msra.mxu0 %v2709_v39 }
 0xadc   :  { %2246 = vmatprep.subr.mxu0 %v2522_v0 }
 0xadd   :  { %v1003_v11 = vpop.permute.xlu1 %1002  ;;  %2247 = vmatpush3.msra.mxu0 %v2721_v40 }
 0xade   :  { %v1005_v12 = vsel %vm189_vm2, %v902_v9, %v1003_v11  ;;  %2281 = vmatprep.subr.mxu0 %v2522_v0 }
 0xadf   :  { %2249 = vmatmul.mubr.msk.f32.vlgmr.msra.gmra.mxu0 %vm396_vm3, %v1005_v12 }
 0xae0   :  { %2282 = vmatpush3.msra.mxu0 %v2579_v2  ;;  %2289 = vmatprep.mubr.msk.f32.mxu0 %vm2523_vm0, %v2522_v0 }
 0xae1   :  { %2283 = vmatprep.subr.mxu0 %v2522_v0 }
 0xae2   :  { %2284 = vmatpush3.msra.mxu0 %v2590_v4 }
 0xae3   :  { %2285 = vmatprep.subr.mxu0 %v2522_v0 }
 0xae4   :  { %2286 = vmatpush3.msra.mxu0 %v2603_v7 }
 0xae5   :  { %2287 = vmatprep.subr.mxu0 %v2522_v0 }
 0xae6   :  { %2288 = vmatpush3.msra.mxu0 %v2611_v8 }
 0xae7   :  { %2292 = vmatprep.subr.mxu0 %v2522_v0 }
 0xb8e   :  { %v971_v14 = vpop.f32.mrf.mxu0 }
 0xb8f   :  { %v975_v15 = vadd.f32 %v971_v14, %v158_v13 }
 0xb90   :  { %v2231_v16 = vpop.f32.mrf.mxu0 }
 0xb91   :  { %2432 = vtanh.f32 %v975_v15  ;;  %v1954_v22 = vmul.f32 -1.442695, %v975_v15 }
 0xb9e   :  { %v2433_v17 = vpop.eup %2432 }
 0xb9f   :  { %v1075_v18 = vpop.f32.mrf.mxu0  ;;  %985 = vrot.lane.b32.xlu0 %v2433_v17, %s2524_s21 }
 0xba0   :  { %v1076_v19 = vadd.f32 %v2774_v52, %v1075_v18 }
 0xba1   :  { %v2250_v20 = vpop.f32.mrf.mxu0 }
 0xba2   :  { %2434 = vtanh.f32 %v1076_v19  ;;  %v1956_v24 = vmul.f32 -1.442695, %v1076_v19 }
 0xba3   :  { %2436 = vpow2.f32 %v1954_v22 }
 0xba4   :  { %2438 = vpow2.f32 %v1956_v24 }
 0xbaf   :  { %v2435_v21 = vpop.eup %2434 }
 0xbb0   :  { %1088 = vrot.lane.b32.xlu1 %v2435_v21, %s2524_s21  ;;  %v2437_v23 = vpop.eup %2436 }
 0xbb1   :  { %v979_v48 = vadd.f32 1.0, %v2437_v23  ;;  %v2439_v25 = vpop.eup %2438 }
 0xbb2   :  { %v1082_v27 = vadd.f32 1.0, %v2439_v25 }
 0xbb3   :  { %2440 = vrcp.f32 %v979_v48 }
 0xbb4   :  { %2442 = vrcp.f32 %v1082_v27 }
 0xbc0   :  { %v2441_v26 = vpop.eup %2440 }
 0xbc1   :  { %v2443_v34 = vpop.eup %2442  ;;  %v983_v41 = vmul.f32 %v2441_v26, %v2873_v58 }
 0xbc2   :  { %v1086_v44 = vmul.f32 %v2443_v34, %v2877_v62 }
 0xc11   :  { %v986_v30 = vpop.permute.xlu0 %985 }
 0xc12   :  { %v988_v32 = vmul.f32 %v2441_v26, %v986_v30 }
 0xc14   :  { %990 = vrot.lane.b32.xlu0 %v988_v32, %s2524_s21 }
 0xc22   :  { %v1089_v37 = vpop.permute.xlu1 %1088 }
 0xc23   :  { %v1091_v38 = vmul.f32 %v2443_v34, %v1089_v37 }
 0xc25   :  { %1093 = vrot.lane.b32.xlu1 %v1091_v38, %s2524_s21 }
 0xc86   :  { %v991_v45 = vpop.permute.xlu0 %990 }
 0xc87   :  { %v2923_v42 = vadd.f32 %v991_v45, %v983_v41 }
 0xc89   :  { %2444 = vtanh.f32 %v2923_v42 }
 0xc96   :  { %v2445_v43 = vpop.eup %2444 }
 0xc97   :  { %v1094_v51 = vpop.permute.xlu1 %1093  ;;  %996 = vrot.lane.b32.xlu0 %v2445_v43, %s2524_s21 }
 0xc98   :  { %v2928_v53 = vadd.f32 %v1094_v51, %v1086_v44 }
 0xc9a   :  { %2446 = vtanh.f32 %v2928_v53 }
 0xca7   :  { %v2447_v54 = vpop.eup %2446 }
 0xca8   :  { %1099 = vrot.lane.b32.xlu1 %v2447_v54, %s2524_s21 }
 0xd09   :  { %v997_v55 = vpop.permute.xlu0 %996 }
 0xd0a   :  { %v999_v46 = vmul.f32 %v2441_v26, %v997_v55 }
 0xd0c   :  { %1104 = vrot.lane.b32.xlu0 %v999_v46, %s2525_s26 }
 0xd1a   :  { %v1100_v56 = vpop.permute.xlu1 %1099 }
 0xd1b   :  { %v1102_v57 = vmul.f32 %v2443_v34, %v1100_v56 }
 0xd1d   :  { %1205 = vrot.lane.b32.xlu1 %v1102_v57, %s2526_s29 }
 0xd7e   :  { %v1105_v58 = vpop.permute.xlu0 %1104 }
 0xd7f   :  { %2260 = vmatmul.mubr.msk.f32.vlgmr.msra.gmra.mxu1 %vm189_vm2, %v1105_v58 }
 0xd80   :  { %2263 = vmatpush3.msra.mxu1 %v2651_v28  ;;  %2278 = vmatprep.mubr.msk.f32.mxu1 %vm2523_vm0, %v2522_v0 }
 0xd81   :  { %2264 = vmatprep.subr.mxu1 %v2522_v0 }
 0xd82   :  { %2265 = vmatpush3.msra.mxu1 %v2657_v29 }
 0xd83   :  { %2266 = vmatprep.subr.mxu1 %v2522_v0 }
 0xd84   :  { %2267 = vmatpush3.msra.mxu1 %v2668_v31 }
 0xd85   :  { %2268 = vmatprep.subr.mxu1 %v2522_v0 }
 0xd86   :  { %2269 = vmatpush3.msra.mxu1 %v2679_v33 }
 0xd87   :  { %2270 = vmatprep.subr.mxu1 %v2522_v0 }
 0xd88   :  { %2271 = vmatpush3.msra.mxu1 %v2690_v35 }
 0xd89   :  { %2272 = vmatprep.subr.mxu1 %v2522_v0 }
 0xd8a   :  { %2273 = vmatpush3.msra.mxu1 %v2698_v36 }
 0xd8b   :  { %2274 = vmatprep.subr.mxu1 %v2522_v0 }
 0xd8c   :  { %2275 = vmatpush3.msra.mxu1 %v2709_v39 }
 0xd8d   :  { %2276 = vmatprep.subr.mxu1 %v2522_v0 }
 0xd8e   :  { %2277 = vmatpush3.msra.mxu1 %v2721_v40 }
 0xd8f   :  { %v1206_v59 = vpop.permute.xlu1 %1205  ;;  %2311 = vmatprep.subr.mxu1 %v2522_v0 }
 0xd90   :  { %v1208_v60 = vsel %vm189_vm2, %v1105_v58, %v1206_v59 }
 0xd91   :  { %2279 = vmatmul.mubr.msk.f32.vlgmr.msra.gmra.mxu1 %vm396_vm3, %v1208_v60 }
 0xd92   :  { %2312 = vmatpush3.msra.mxu1 %v2579_v2  ;;  %2319 = vmatprep.mubr.msk.f32.mxu1 %vm2523_vm0, %v2522_v0  ;;  %v163_v2 = vadd.f32 %v2761_v47, %v2634_v10 }
 0xd93   :  { %2313 = vmatprep.subr.mxu1 %v2522_v0 }
 0xd94   :  { %2314 = vmatpush3.msra.mxu1 %v2590_v4 }
 0xd95   :  { %2315 = vmatprep.subr.mxu1 %v2522_v0 }
 0xd96   :  { %2316 = vmatpush3.msra.mxu1 %v2603_v7 }
 0xd97   :  { %2317 = vmatprep.subr.mxu1 %v2522_v0 }
 0xd98   :  { %2318 = vmatpush3.msra.mxu1 %v2611_v8 }
 0xd99   :  { %2322 = vmatprep.subr.mxu1 %v2522_v0 }
 0xe3f   :  { %v1174_v61 = vpop.f32.mrf.mxu1 }
 0xe40   :  { %v1178_v62 = vadd.f32 %v1174_v61, %v163_v2 }
 0xe41   :  { %v2261_v63 = vpop.f32.mrf.mxu1 }
 0xe42   :  { %2448 = vtanh.f32 %v1178_v62  ;;  %v1958_v8 = vmul.f32 -1.442695, %v1178_v62 }
 0xe4f   :  { %v2449_v1 = vpop.eup %2448 }
 0xe50   :  { %1188 = vrot.lane.b32.xlu0 %v2449_v1, %s2524_s21 }
 0xe51   :  { %v1278_v4 = vpop.f32.mrf.mxu1 }
 0xe52   :  { %v1279_v3 = vadd.f32 %v2774_v52, %v1278_v4 }
 0xe53   :  { %v2280_v7 = vpop.f32.mrf.mxu1 }
 0xe54   :  { %2450 = vtanh.f32 %v1279_v3  ;;  %v1960_v9 = vmul.f32 -1.442695, %v1279_v3 }
 0xe55   :  { %2452 = vpow2.f32 %v1958_v8  ;;  %v2512_v8 = vld [vmem:[%s3128_s4 + $0x38] sm:$0xff] }
 0xe56   :  { %2454 = vpow2.f32 %v1960_v9  ;;  %v2514_v9 = vld [vmem:[%s3128_s4 + $0x28] sm:$0xff] }
 0xe61   :  { %v2451_v5 = vpop.eup %2450 }
 0xe62   :  { %1291 = vrot.lane.b32.xlu1 %v2451_v5, %s2524_s21  ;;  %v2453_v6 = vpop.eup %2452 }
 0xe63   :  { %v1182_v47 = vadd.f32 1.0, %v2453_v6  ;;  %v2455_v11 = vpop.eup %2454  ;;  %v2513_v6 = vld [vmem:[%s3128_s4 + $0x30] sm:$0xff] }
 0xe64   :  { %v1285_v15 = vadd.f32 1.0, %v2455_v11  ;;  %v2516_v11 = vld [vmem:[%s3128_s4 + $0x18] sm:$0xff] }
 0xe65   :  { %2456 = vrcp.f32 %v1182_v47  ;;  %v2515_v47 = vld [vmem:[%s3128_s4 + $0x20] sm:$0xff] }
 0xe66   :  { %2458 = vrcp.f32 %v1285_v15 }
 0xe72   :  { %v2457_v12 = vpop.eup %2456 }
 0xe73   :  { %v2459_v16 = vpop.eup %2458  ;;  %v1186_v19 = vmul.f32 %v2457_v12, %v2923_v42 }
 0xe74   :  { %v1289_v23 = vmul.f32 %v2459_v16, %v2928_v53 }
 0xec2   :  { %v1189_v13 = vpop.permute.xlu0 %1188 }
 0xec3   :  { %v1191_v14 = vmul.f32 %v2457_v12, %v1189_v13  ;;  %v2518_v13 = vld [vmem:[%s3128_s4 + $0x8] sm:$0xff] }
 0xec5   :  { %1193 = vrot.lane.b32.xlu0 %v1191_v14, %s2524_s21  ;;  %v2519_v14 = vld [vmem:[%s3128_s4] sm:$0xff] }
 0xed4   :  { %v1292_v17 = vpop.permute.xlu1 %1291 }
 0xed5   :  { %v1294_v18 = vmul.f32 %v2459_v16, %v1292_v17  ;;  %v2520_v17 = vld [vmem:[%s3127_s3] ss:$0 sm:$0xff] }
 0xed7   :  { %1296 = vrot.lane.b32.xlu1 %v1294_v18, %s2524_s21  ;;  %v173_v18 = vadd.f32 %v2520_v17, %v2765_v49 }
 0xf37   :  { %v1194_v20 = vpop.permute.xlu0 %1193 }
 0xf38   :  { %v2973_v21 = vadd.f32 %v1194_v20, %v1186_v19 }
 0xf3a   :  { %2460 = vtanh.f32 %v2973_v21 }
 0xf47   :  { %v2461_v22 = vpop.eup %2460 }
 0xf48   :  { %1199 = vrot.lane.b32.xlu0 %v2461_v22, %s2524_s21 }
 0xf49   :  { %v1297_v24 = vpop.permute.xlu1 %1296 }
 0xf4a   :  { %v2978_v48 = vadd.f32 %v1297_v24, %v1289_v23 }
 0xf4c   :  { %2462 = vtanh.f32 %v2978_v48 }
 0xf59   :  { %v2463_v25 = vpop.eup %2462 }
 0xf5a   :  { %1302 = vrot.lane.b32.xlu1 %v2463_v25, %s2524_s21 }
 0xfba   :  { %v1200_v26 = vpop.permute.xlu0 %1199 }
 0xfbb   :  { %v1202_v27 = vmul.f32 %v2457_v12, %v1200_v26  ;;  %v2517_v12 = vld [vmem:[%s3128_s4 + $0x10] sm:$0xff] }
 0xfbd   :  { %1307 = vrot.lane.b32.xlu0 %v1202_v27, %s2525_s26 }
 0xfcc   :  { %v1303_v30 = vpop.permute.xlu1 %1302 }
 0xfcd   :  { %v1305_v32 = vmul.f32 %v2459_v16, %v1303_v30 }
 0xfcf   :  { %1408 = vrot.lane.b32.xlu1 %v1305_v32, %s2526_s29 }
0x102f   :  { %v1308_v34 = vpop.permute.xlu0 %1307 }
0x1030   :  { %2290 = vmatmul.mubr.msk.f32.vlgmr.msra.gmra.mxu0 %vm189_vm2, %v1308_v34 }
0x1031   :  { %2293 = vmatpush3.msra.mxu0 %v2651_v28  ;;  %2308 = vmatprep.mubr.msk.f32.mxu0 %vm2523_vm0, %v2522_v0 }
0x1032   :  { %2294 = vmatprep.subr.mxu0 %v2522_v0 }
0x1033   :  { %2295 = vmatpush3.msra.mxu0 %v2657_v29 }
0x1034   :  { %2296 = vmatprep.subr.mxu0 %v2522_v0 }
0x1035   :  { %2297 = vmatpush3.msra.mxu0 %v2668_v31 }
0x1036   :  { %2298 = vmatprep.subr.mxu0 %v2522_v0 }
0x1037   :  { %2299 = vmatpush3.msra.mxu0 %v2679_v33 }
0x1038   :  { %2300 = vmatprep.subr.mxu0 %v2522_v0 }
0x1039   :  { %2301 = vmatpush3.msra.mxu0 %v2690_v35 }
0x103a   :  { %2302 = vmatprep.subr.mxu0 %v2522_v0 }
0x103b   :  { %2303 = vmatpush3.msra.mxu0 %v2698_v36 }
0x103c   :  { %2304 = vmatprep.subr.mxu0 %v2522_v0 }
0x103d   :  { %2305 = vmatpush3.msra.mxu0 %v2709_v39 }
0x103e   :  { %2306 = vmatprep.subr.mxu0 %v2522_v0 }
0x103f   :  { %2307 = vmatpush3.msra.mxu0 %v2721_v40 }
0x1040   :  { %2341 = vmatprep.subr.mxu0 %v2522_v0 }
0x1041   :  { %v1409_v37 = vpop.permute.xlu1 %1408 }
0x1042   :  { %v1411_v38 = vsel %vm189_vm2, %v1308_v34, %v1409_v37 }
0x1043   :  { %2309 = vmatmul.mubr.msk.f32.vlgmr.msra.gmra.mxu0 %vm396_vm3, %v1411_v38 }
0x1044   :  { %2342 = vmatpush3.msra.mxu0 %v2651_v28  ;;  %2357 = vmatprep.mubr.msk.f32.mxu0 %vm2523_vm0, %v2522_v0  ;;  %v168_v28 = vadd.f32 %v2634_v10, %v2767_v50 }
0x1045   :  { %2343 = vmatprep.subr.mxu0 %v2522_v0 }
0x1046   :  { %2344 = vmatpush3.msra.mxu0 %v2657_v29 }
0x1047   :  { %2345 = vmatprep.subr.mxu0 %v2522_v0 }
0x1048   :  { %2346 = vmatpush3.msra.mxu0 %v2668_v31 }
0x1049   :  { %2347 = vmatprep.subr.mxu0 %v2522_v0 }
0x104a   :  { %2348 = vmatpush3.msra.mxu0 %v2679_v33 }
0x104b   :  { %2349 = vmatprep.subr.mxu0 %v2522_v0 }
0x104c   :  { %2350 = vmatpush3.msra.mxu0 %v2690_v35 }
0x104d   :  { %2351 = vmatprep.subr.mxu0 %v2522_v0 }
0x104e   :  { %2352 = vmatpush3.msra.mxu0 %v2698_v36 }
0x104f   :  { %2353 = vmatprep.subr.mxu0 %v2522_v0 }
0x1050   :  { %2354 = vmatpush3.msra.mxu0 %v2709_v39 }
0x1051   :  { %2355 = vmatprep.subr.mxu0 %v2522_v0 }
0x1052   :  { %2356 = vmatpush3.msra.mxu0 %v2721_v40 }
0x10f0   :  { %v1377_v29 = vpop.f32.mrf.mxu0 }
0x10f1   :  { %v1381_v31 = vadd.f32 %v1377_v29, %v168_v28 }
0x10f2   :  { %v2291_v33 = vpop.f32.mrf.mxu0 }
0x10f3   :  { %2464 = vtanh.f32 %v1381_v31  ;;  %v1962_v42 = vmul.f32 -1.442695, %v1381_v31 }
0x1100   :  { %v2465_v35 = vpop.eup %2464 }
0x1101   :  { %1391 = vrot.lane.b32.xlu0 %v2465_v35, %s2524_s21 }
0x1103   :  { %v1481_v41 = vpop.f32.mrf.mxu0 }
0x1104   :  { %v1482_v36 = vadd.f32 %v2774_v52, %v1481_v41 }
0x1105   :  { %v2310_v45 = vpop.f32.mrf.mxu0 }
0x1106   :  { %2466 = vtanh.f32 %v1482_v36  ;;  %v1964_v10 = vmul.f32 -1.442695, %v1482_v36 }
0x1107   :  { %2468 = vpow2.f32 %v1962_v42 }
0x1113   :  { %v2467_v39 = vpop.eup %2466 }
0x1114   :  { %1494 = vrot.lane.b32.xlu1 %v2467_v39, %s2524_s21  ;;  %v2469_v40 = vpop.eup %2468 }
0x1115   :  { %v1385_v43 = vadd.f32 1.0, %v2469_v40 }
0x1117   :  { %2470 = vrcp.f32 %v1385_v43 }
0x1118   :  { %2472 = vpow2.f32 %v1964_v10 }
0x1124   :  { %v2471_v50 = vpop.eup %2470 }
0x1125   :  { %v2473_v44 = vpop.eup %2472  ;;  %v1389_v57 = vmul.f32 %v2471_v50, %v2973_v21 }
0x1126   :  { %v1488_v54 = vadd.f32 1.0, %v2473_v44 }
0x1128   :  { %2474 = vrcp.f32 %v1488_v54 }
0x1135   :  { %v2475_v55 = vpop.eup %2474 }
0x1136   :  { %v1492_v2 = vmul.f32 %v2475_v55, %v2978_v48 }
0x1173   :  { %v1392_v51 = vpop.permute.xlu0 %1391 }
0x1174   :  { %v1394_v53 = vmul.f32 %v2471_v50, %v1392_v51 }
0x1176   :  { %1396 = vrot.lane.b32.xlu0 %v1394_v53, %s2524_s21 }
0x1186   :  { %v1495_v46 = vpop.permute.xlu1 %1494 }
0x1187   :  { %v1497_v56 = vmul.f32 %v2475_v55, %v1495_v46 }
0x1189   :  { %1499 = vrot.lane.b32.xlu1 %v1497_v56, %s2524_s21 }
0x11e8   :  { %v1397_v58 = vpop.permute.xlu0 %1396 }
0x11e9   :  { %v3030_v59 = vadd.f32 %v1397_v58, %v1389_v57 }
0x11eb   :  { %2476 = vtanh.f32 %v3030_v59 }
0x11f8   :  { %v2477_v60 = vpop.eup %2476 }
0x11f9   :  { %1402 = vrot.lane.b32.xlu0 %v2477_v60, %s2524_s21 }
0x11fb   :  { %v1500_v61 = vpop.permute.xlu1 %1499 }
0x11fc   :  { %v3035_v62 = vadd.f32 %v1500_v61, %v1492_v2 }
0x11fe   :  { %2478 = vtanh.f32 %v3035_v62 }
0x120b   :  { %v2479_v63 = vpop.eup %2478 }
0x120c   :  { %1505 = vrot.lane.b32.xlu1 %v2479_v63, %s2524_s21 }
0x126b   :  { %v1403_v1 = vpop.permute.xlu0 %1402 }
0x126c   :  { %v1405_v4 = vmul.f32 %v2471_v50, %v1403_v1 }
0x126e   :  { %1510 = vrot.lane.b32.xlu0 %v1405_v4, %s2525_s26 }
0x127e   :  { %v1506_v3 = vpop.permute.xlu1 %1505 }
0x127f   :  { %v1508_v7 = vmul.f32 %v2475_v55, %v1506_v3  ;;  %v2521_v55 = vld [vmem:[%s3129_s5] ss:$0 sm:$0xff]  ;;  %v1821_v3 = vld [vmem:[%s3130_s6 + $0x18] sm:$0xff] }
0x1281   :  { %1611 = vrot.lane.b32.xlu1 %v1508_v7, %s2526_s29  ;;  %v1820_v7 = vld [vmem:[%s3130_s6 + $0x10] sm:$0xff] }
0x12e0   :  { %v1511_v5 = vpop.permute.xlu0 %1510 }
0x12e1   :  { %2320 = vmatmul.mubr.msk.f32.vlgmr.msra.gmra.mxu1 %vm189_vm2, %v1511_v5 }
0x12e2   :  { %2323 = vmatpush3.msra.mxu1 %v2512_v8  ;;  %2338 = vmatprep.mubr.msk.f32.mxu1 %vm2523_vm0, %v2522_v0  ;;  %v1818_v8 = vld [vmem:[%s3130_s6] sm:$0xff] }
0x12e3   :  { %2324 = vmatprep.subr.mxu1 %v2522_v0 }
0x12e4   :  { %2325 = vmatpush3.msra.mxu1 %v2513_v6 }
0x12e5   :  { %2326 = vmatprep.subr.mxu1 %v2522_v0 }
0x12e6   :  { %2327 = vmatpush3.msra.mxu1 %v2514_v9 }
0x12e7   :  { %2328 = vmatprep.subr.mxu1 %v2522_v0 }
0x12e8   :  { %2329 = vmatpush3.msra.mxu1 %v2515_v47 }
0x12e9   :  { %2330 = vmatprep.subr.mxu1 %v2522_v0 }
0x12ea   :  { %2331 = vmatpush3.msra.mxu1 %v2516_v11 }
0x12eb   :  { %2332 = vmatprep.subr.mxu1 %v2522_v0 }
0x12ec   :  { %2333 = vmatpush3.msra.mxu1 %v2517_v12  ;;  %v1971_v12 = vld [vmem:[%s3131_s7] ss:$0 sm:$0xff] }
0x12ed   :  { %2334 = vmatprep.subr.mxu1 %v2522_v0 }
0x12ee   :  { %2335 = vmatpush3.msra.mxu1 %v2518_v13 }
0x12ef   :  { %2336 = vmatprep.subr.mxu1 %v2522_v0 }
0x12f0   :  { %2337 = vmatpush3.msra.mxu1 %v2519_v14 }
0x12f1   :  { %2360 = vmatprep.subr.mxu1 %v1821_v3 }
0x12f3   :  { %v1612_v15 = vpop.permute.xlu1 %1611 }
0x12f4   :  { %v1614_v16 = vsel %vm189_vm2, %v1511_v5, %v1612_v15  ;;  %v1819_v5 = vld [vmem:[%s3130_s6 + $0x8] sm:$0xff] }
0x12f5   :  { %2339 = vmatmul.mubr.msk.f32.vlgmr.msra.gmra.mxu1 %vm396_vm3, %v1614_v16 }
0x12f6   :  { %2361 = vmatpush3.msra.mxu1 %v1821_v3 }
0x12f7   :  { %2362 = vmatprep.subr.mxu1 %v1820_v7 }
0x12f8   :  { %2363 = vmatpush3.msra.mxu1 %v1820_v7 }
0x12f9   :  { %2364 = vmatprep.subr.mxu1 %v1819_v5 }
0x12fa   :  { %2365 = vmatpush3.msra.mxu1 %v1819_v5 }
0x12fb   :  { %2366 = vmatprep.subr.mxu1 %v1818_v8 }
0x12fc   :  { %2367 = vmatpush3.msra.mxu1 %v1818_v8 }
0x13a1   :  { %v1580_v19 = vpop.f32.mrf.mxu1 }
0x13a2   :  { %v1584_v20 = vadd.f32 %v1580_v19, %v173_v18 }
0x13a3   :  { %v2321_v21 = vpop.f32.mrf.mxu1 }
0x13a4   :  { %2480 = vtanh.f32 %v1584_v20  ;;  %v1966_v25 = vmul.f32 -1.442695, %v1584_v20 }
0x13b1   :  { %v2481_v0 = vpop.eup %2480 }
0x13b2   :  { %1594 = vrot.lane.b32.xlu0 %v2481_v0, %s2524_s21 }
0x13b5   :  { %v1684_v22 = vpop.f32.mrf.mxu1 }
0x13b6   :  { %v1685_v23 = vadd.f32 %v2774_v52, %v1684_v22 }
0x13b7   :  { %v2340_v24 = vpop.f32.mrf.mxu1 }
0x13b8   :  { %2482 = vtanh.f32 %v1685_v23  ;;  %v1968_v49 = vmul.f32 -1.442695, %v1685_v23 }
0x13b9   :  { %2484 = vpow2.f32 %v1966_v25 }
0x13c5   :  { %v2483_v48 = vpop.eup %2482 }
0x13c6   :  { %1697 = vrot.lane.b32.xlu1 %v2483_v48, %s2524_s21  ;;  %v2485_v26 = vpop.eup %2484 }
0x13c7   :  { %v1588_v27 = vadd.f32 1.0, %v2485_v26 }
0x13c9   :  { %2486 = vrcp.f32 %v1588_v27 }
0x13ca   :  { %2488 = vpow2.f32 %v1968_v49 }
0x13d6   :  { %v2487_v30 = vpop.eup %2486 }
0x13d7   :  { %v2489_v34 = vpop.eup %2488  ;;  %v1592_v31 = vmul.f32 %v2487_v30, %v3030_v59 }
0x13d8   :  { %v1691_v38 = vadd.f32 1.0, %v2489_v34 }
0x13da   :  { %2490 = vrcp.f32 %v1691_v38 }
0x13e7   :  { %v2491_v52 = vpop.eup %2490 }
0x13e8   :  { %v1695_v36 = vmul.f32 %v2491_v52, %v3035_v62 }
0x1424   :  { %v1595_v32 = vpop.permute.xlu0 %1594 }
0x1425   :  { %v1597_v37 = vmul.f32 %v2487_v30, %v1595_v32 }
0x1427   :  { %1599 = vrot.lane.b32.xlu0 %v1597_v37, %s2524_s21 }
0x1438   :  { %v1698_v28 = vpop.permute.xlu1 %1697 }
0x1439   :  { %v1700_v29 = vmul.f32 %v2491_v52, %v1698_v28 }
0x143b   :  { %1702 = vrot.lane.b32.xlu1 %v1700_v29, %s2524_s21 }
0x1499   :  { %v1600_v33 = vpop.permute.xlu0 %1599 }
0x149a   :  { %v1602_v35 = vadd.f32 %v1600_v33, %v1592_v31 }
0x149c   :  { %2492 = vtanh.f32 %v1602_v35 }
0x14a9   :  { %v2493_v41 = vpop.eup %2492 }
0x14aa   :  { %1605 = vrot.lane.b32.xlu0 %v2493_v41, %s2524_s21 }
0x14ad   :  { %v1703_v45 = vpop.permute.xlu1 %1702 }
0x14ae   :  { %v1705_v39 = vadd.f32 %v1703_v45, %v1695_v36 }
0x14b0   :  { %2494 = vtanh.f32 %v1705_v39 }
0x14bd   :  { %v2495_v42 = vpop.eup %2494 }
0x14be   :  { %1708 = vrot.lane.b32.xlu1 %v2495_v42, %s2524_s21 }
0x151c   :  { %v1606_v40 = vpop.permute.xlu0 %1605 }
0x151d   :  { %v1608_v43 = vmul.f32 %v2487_v30, %v1606_v40 }
0x151f   :  { %1713 = vrot.lane.b32.xlu0 %v1608_v43, %s2525_s26 }
0x1530   :  { %v1709_v10 = vpop.permute.xlu1 %1708 }
0x1531   :  { %v1711_v50 = vmul.f32 %v2491_v52, %v1709_v10 }
0x1533   :  { %1717 = vrot.lane.b32.xlu1 %v1711_v50, %s2526_s29 }
0x1591   :  { %v1714_v44 = vpop.permute.xlu0 %1713 }
0x1592   :  { %2368 = vmatprep.mubr.msk.f32.mxu1 %vm189_vm2, %v1714_v44 }
0x15a5   :  { %v1718_v51 = vpop.permute.xlu1 %1717 }
0x15a6   :  { %v1720_v53 = vsel %vm189_vm2, %v1714_v44, %v1718_v51 }
0x15a7   :  { %2358 = vmatmul.mubr.msk.f32.vlgmr.msra.gmra.mxu0 %vm396_vm3, %v1720_v53 }
0x1667   :  { %v1790_v54 = vpop.f32.mrf.mxu0 }
0x1668   :  { %v1791_v46 = vadd.f32 %v2521_v55, %v1790_v54 }
0x1669   :  { %v2359_v56 = vpop.f32.mrf.mxu0 }
0x166a   :  { %2496 = vtanh.f32 %v1791_v46  ;;  %v1970_v58 = vmul.f32 -1.442695, %v1791_v46 }
0x166c   :  { %2498 = vpow2.f32 %v1970_v58 }
0x1677   :  { %v2497_v57 = vpop.eup %2496 }
0x1678   :  { %1803 = vrot.lane.b32.xlu0 %v2497_v57, %s2524_s21 }
0x1679   :  { %v2499_v59 = vpop.eup %2498 }
0x167a   :  { %v1797_v60 = vadd.f32 1.0, %v2499_v59 }
0x167c   :  { %2500 = vrcp.f32 %v1797_v60 }
0x1689   :  { %v2501_v2 = vpop.eup %2500 }
0x168a   :  { %v1801_v63 = vmul.f32 %v2501_v2, %v1705_v39 }
0x16ea   :  { %v1804_v61 = vpop.permute.xlu0 %1803 }
0x16eb   :  { %v1806_v62 = vmul.f32 %v2501_v2, %v1804_v61 }
0x16ed   :  { %1808 = vrot.lane.b32.xlu1 %v1806_v62, %s2524_s21 }
0x175f   :  { %v1809_v1 = vpop.permute.xlu1 %1808 }
0x1760   :  { %v1811_v4 = vadd.f32 %v1809_v1, %v1801_v63 }
0x1762   :  { %2502 = vtanh.f32 %v1811_v4 }
0x176f   :  { %v2503_v6 = vpop.eup %2502 }
0x1770   :  { %1814 = vrot.lane.b32.xlu0 %v2503_v6, %s2524_s21 }
0x17e2   :  { %v1815_v9 = vpop.permute.xlu0 %1814 }
0x17e3   :  { %v1817_v47 = vmul.f32 %v2501_v2, %v1815_v9 }
0x17e5   :  { %1830 = vrot.lane.b32.xlu1 %v1817_v47, %s2525_s26 }
0x1857   :  { %v1831_v11 = vpop.permute.xlu1 %1830 }
0x1858   :  { %2369 = vmatmul.mubr.msk.f32.vlgmr.msra.gmra.mxu1 %vm189_vm2, %v1831_v11 }
0x1918   :  { %v2370_v13 = vpop.f32.mrf.mxu1 }
0x1919   :  { %v1908_v14 = vadd.f32 %v2370_v13, %v1971_v12 }
0x191a   :  { %v1902_v15 = vpop.f32.mrf.mxu1 }
0x191b   :  { %v1975_v16 = vmul.f32 -1.442695, %v1908_v14  ;;  %v1903_v17 = vadd.f32 %v1971_v12, %v1902_v15 }
0x191d   :  { %2504 = vpow2.f32 %v1975_v16  ;;  %v1974_v18 = vmul.f32 -1.442695, %v1903_v17 }
0x191f   :  { %2506 = vpow2.f32 %v1974_v18 }
0x192a   :  { %v2505_v19 = vpop.eup %2504 }
0x192b   :  { %v1918_v20 = vadd.f32 1.0, %v2505_v19 }
0x192c   :  { %v2507_v21 = vpop.eup %2506 }
0x192d   :  { %2508 = vrcp.f32 %v1918_v20  ;;  %v1917_v0 = vadd.f32 1.0, %v2507_v21 }
0x192f   :  { %2510 = vrcp.f32 %v1917_v0 }
0x193a   :  { %v2509_v22 = vpop.eup %2508 }
0x193b   :  { %1925 = vst.msk [vmem:[%s3132_s8 + $0x8] sm:$0xff] %vm1923_vm4, %v2509_v22 }
0x193c   :  { %v2511_v23 = vpop.eup %2510 }
0x193d   :  { %1924 = vst.msk [vmem:[%s3132_s8] sm:$0xff] %vm1923_vm4, %v2511_v23 }

</bundles_post_ra>
